<compile_context>
chip_gen: v7x
topology: tpu7x:2x2x1
jax: 0.10.0
libtpu: 0.0.40
codegen_flags: <defaults>
</compile_context>

<pallas_src>
import functools
import math

import jax
import jax.numpy as jnp
from jax import lax
from jax.experimental import pallas as pl
from jax.experimental.pallas import tpu as pltpu

_PLANE = 128          # lane-aligned per-component plane width for the rot6d head
_SLOPE = 0.01         # nn.LeakyReLU default negative_slope
_NORM_EPS = 1e-12     # F.normalize default eps


def _leaky_relu(x, slope=_SLOPE):
    return jnp.where(x > 0, x, slope * x)


def _round_up(x, m):
    return (x + m - 1) // m * m


def _generator_kernel(x_ref,                     # (TB, 256) bf16
                      w1_ref, b1_ref,            # enc Linear1 (BN1 folded)
                      w2_ref, b2_ref,            # enc Linear2 (BN2 folded)
                      w3_ref, b3_ref,            # enc Linear3
                      wz_ref, bz_ref,            # fused mu @ dec Linear1
                      wd2_ref, bd2_ref,          # dec Linear2
                      wd3_ref, bd3_ref,          # dec Linear3 (plane-padded)
                      out_ref):                  # (TB, 9*_PLANE) f32
    P = _PLANE

    def mm(a, w_ref, b_ref):
        return jnp.dot(a.astype(jnp.bfloat16), w_ref[...],
                       preferred_element_type=jnp.float32) + b_ref[...]

    # ------------- encoder (eval mode: BN folded, Dropout identity) -------------
    h = _leaky_relu(mm(x_ref[...], w1_ref, b1_ref))
    h = mm(h, w2_ref, b2_ref)
    h = mm(h, w3_ref, b3_ref)
    # (vae=False -> q_z_sample = q_z.mean = mu(h); logvar/softplus head unused)

    # ------------- decoder (mu fused with dec Linear1) -------------
    d = _leaky_relu(mm(h, wz_ref, bz_ref))
    d = _leaky_relu(mm(d, wd2_ref, bd2_ref))
    r = mm(d, wd3_ref, bd3_ref)          # (TB, 6*P) f32, component-major planes

    ax = r[:, 0 * P:1 * P]
    ay = r[:, 1 * P:2 * P]
    az = r[:, 2 * P:3 * P]
    bx = r[:, 3 * P:4 * P]
    by = r[:, 4 * P:5 * P]
    bz = r[:, 5 * P:6 * P]

    # ContinousRotReprDecoder (Gram-Schmidt of 3x2 -> 3x3), f32 epilogue,
    # rsqrt routed to the EUP slot.
    eps2 = _NORM_EPS * _NORM_EPS
    inv_na = lax.rsqrt(jnp.maximum(ax * ax + ay * ay + az * az, eps2))
    b1x, b1y, b1z = ax * inv_na, ay * inv_na, az * inv_na

    dot = b1x * bx + b1y * by + b1z * bz
    ux, uy, uz = bx - dot * b1x, by - dot * b1y, bz - dot * b1z
    inv_nu = lax.rsqrt(jnp.maximum(ux * ux + uy * uy + uz * uz, eps2))
    b2x, b2y, b2z = ux * inv_nu, uy * inv_nu, uz * inv_nu

    b3x = b1y * b2z - b1z * b2y
    b3y = b1z * b2x - b1x * b2z
    b3z = b1x * b2y - b1y * b2x

    # Row-major 3x3 per joint: [b1x,b2x,b3x,b1y,b2y,b3y,b1z,b2z,b3z],
    # each component as a 128-lane plane -> unmasked lane-dense store.
    out_ref[...] = jnp.concatenate(
        (b1x, b2x, b3x, b1y, b2y, b3y, b1z, b2z, b3z), axis=1)


# ---------------------------------------------------------------------------
# Parameters (PyTorch-style raw) and one-time preparation (hoisted).
# ---------------------------------------------------------------------------
def make_generator_params(key, num_joints_in=27, num_joints_out=27,
                          hidden_feature=256, latent_dim=32):
    """Deterministic synthetic parameters with PyTorch-default-style init."""
    def lin(k, fan_in, fan_out):
        kw, kb = jax.random.split(k)
        bound = 1.0 / math.sqrt(fan_in)
        return {'w': jax.random.uniform(kw, (fan_out, fan_in), jnp.float32,
                                        -bound, bound),
                'b': jax.random.uniform(kb, (fan_out,), jnp.float32,
                                        -bound, bound)}

    def bn(n):
        return {'gamma': jnp.ones((n,), jnp.float32),
                'beta': jnp.zeros((n,), jnp.float32),
                'mean': jnp.zeros((n,), jnp.float32),
                'var': jnp.ones((n,), jnp.float32)}

    ks = jax.random.split(key, 8)
    f_in, h, ld = num_joints_in * 9, hidden_feature, latent_dim
    return {
        'bn1': bn(f_in),
        'enc1': lin(ks[0], f_in, h),
        'bn2': bn(h),
        'enc2': lin(ks[1], h, h),
        'enc3': lin(ks[2], h, h),
        'mu': lin(ks[3], h, ld),
        'logvar': lin(ks[4], h, ld),     # present in the module, unused (vae=False)
        'dec1': lin(ks[5], ld, h),
        'dec2': lin(ks[6], h, h),
        'dec3': lin(ks[7], h, num_joints_out * 6),
    }


def prepare_generator_params(raw, *, bn_eps=1e-5):
    """One-time prep (hoisted out of the hot path):
       * fold eval-mode BN into the following Linear (y = W(s*x+t)+b),
       * transpose weights to (in, out),
       * fuse mu (H->L) with decoder Linear1 (L->H) into one HxH affine,
       * zero-pad the input feature dim to a multiple of 128,
       * permute + pad the rot6d head to 128-lane component-major planes,
       * cast weights to bf16 (biases stay f32 for the f32 accumulators)."""
    def fold(bn_p, lin_p):
        s = bn_p['gamma'] / jnp.sqrt(bn_p['var'] + bn_eps)
        t = bn_p['beta'] - bn_p['mean'] * s
        w = lin_p['w'].T * s[:, None]                  # (in, out)
        b = lin_p['b'] + lin_p['w'] @ t                # (out,)
        return w, b

    def tpose(lin_p):
        return lin_p['w'].T, lin_p['b']

    w1, b1 = fold(raw['bn1'], raw['enc1'])             # (J_in*9, H)
    w2, b2 = fold(raw['bn2'], raw['enc2'])
    w3, b3 = tpose(raw['enc3'])
    wmu, bmu = tpose(raw['mu'])                        # (H, L)
    wd1, bd1 = tpose(raw['dec1'])                      # (L, H)
    wd2, bd2 = tpose(raw['dec2'])
    wd3, bd3 = tpose(raw['dec3'])                      # (H, 6J)

    # Fuse mu and dec1 (no nonlinearity in between): exact affine composition.
    wz = wmu @ wd1                                     # (H, H)
    bz = bmu @ wd1 + bd1                               # (H,)

    # Pad the input feature dim with zero rows so K is a multiple of 128.
    f_in = w1.shape[0]
    f_in_pad = _round_up(f_in, 128)
    if f_in_pad != f_in:
        w1 = jnp.pad(w1, ((0, f_in_pad - f_in), (0, 0)))

    # rot6d head: PyTorch flattens per joint as [[e0,e1],[e2,e3],[e4,e5]]
    # (column0 = e0,e2,e4; column1 = e1,e3,e5).  Permute to component-major
    # planes [a_x,a_y,a_z,b_x,b_y,b_z] and pad each plane to _PLANE lanes.
    hdim = wd3.shape[0]
    j = wd3.shape[1] // 6
    assert j <= _PLANE
    src = jnp.array([0, 2, 4, 1, 3, 5])
    wd3_planes = wd3.reshape(hdim, j, 6)[:, :, src].transpose(0, 2, 1)   # (H,6,J)
    bd3_planes = bd3.reshape(j, 6)[:, src].T                             # (6,J)
    wd3p = jnp.pad(wd3_planes, ((0, 0), (0, 0), (0, _PLANE - j))
                   ).reshape(hdim, 6 * _PLANE)
    bd3p = jnp.pad(bd3_planes, ((0, 0), (0, _PLANE - j))).reshape(6 * _PLANE)

    bf = lambda w: w.astype(jnp.bfloat16)
    row = lambda b: b.reshape(1, -1).astype(jnp.float32)
    return {
        'w1': bf(w1), 'b1': row(b1),
        'w2': bf(w2), 'b2': row(b2),
        'w3': bf(w3), 'b3': row(b3),
        'wz': bf(wz), 'bz': row(bz),
        'wd2': bf(wd2), 'bd2': row(bd2),
        'wd3': bf(wd3p), 'bd3': row(bd3p),
    }


# ---------------------------------------------------------------------------
# Forward wrapper
# ---------------------------------------------------------------------------
@functools.partial(jax.jit, static_argnames=("num_joints_out", "block_b"))
def generator_forward(pose, params, *, num_joints_out=27, block_b=512):
    """pose: (B, J_in, 9) or (B, J_in*9) float32 (input_type='matrot').
    Returns pose_matrot of shape (B, J_out, 9), matching Generator.forward."""
    batch = pose.shape[0]
    x = pose.reshape(batch, -1).astype(jnp.float32)
    f_in = x.shape[1]
    f_in_pad = params['w1'].shape[0]
    f_out = 9 * _PLANE

    # Feature padding (matches the zero rows added to w1 in prep).
    if f_in_pad != f_in:
        x = jnp.pad(x, ((0, 0), (0, f_in_pad - f_in)))
    x = x.astype(jnp.bfloat16)

    # Batch tile: multiples of 16 (bf16 sublane packing); fill the MXU M dim
    # at large B, but keep >=2 grid steps when splitting is possible so both
    # v7x TensorCores get work (dimension_semantics=("parallel",)).
    tb_full = _round_up(max(batch, 1), 16)
    if tb_full <= block_b:
        tb = tb_full
    else:
        tb = min(block_b, _round_up((tb_full + 1) // 2, 16))
    bp = _round_up(batch, tb)
    if bp != batch:
        x = jnp.pad(x, ((0, bp - batch), (0, 0)))      # zero rows stay finite

    weights = (params['w1'], params['b1'], params['w2'], params['b2'],
               params['w3'], params['b3'], params['wz'], params['bz'],
               params['wd2'], params['bd2'], params['wd3'], params['bd3'])

    x_spec = pl.BlockSpec((tb, f_in_pad), lambda i: (i, 0))
    out_spec = pl.BlockSpec((tb, f_out), lambda i: (i, 0))
    w_specs = [pl.BlockSpec(w.shape, lambda i: (0, 0)) for w in weights]

    flops = 2 * bp * sum(int(w.shape[0]) * int(w.shape[1]) for w in weights[::2])
    bytes_accessed = (2 * bp * f_in_pad + 4 * bp * f_out
                      + 2 * sum(int(w.size) for w in weights[::2])
                      + 4 * sum(int(b.size) for b in weights[1::2]))

    out = pl.pallas_call(
        _generator_kernel,
        out_shape=jax.ShapeDtypeStruct((bp, f_out), jnp.float32),
        grid=(bp // tb,),
        in_specs=[x_spec] + w_specs,
        out_specs=out_spec,
        compiler_params=pltpu.CompilerParams(
            dimension_semantics=("parallel",),
            vmem_limit_bytes=32 * 1024 * 1024),
        cost_estimate=pl.CostEstimate(flops=flops,
                                      transcendentals=2 * bp * _PLANE,
                                      bytes_accessed=bytes_accessed),
    )(x, *weights)

    out = out[:batch]                                   # drop batch padding
    # 9 lane-aligned planes (B, 9, 128) -> slice joints -> PyTorch (B, J, 9)
    out = out.reshape(batch, 9, _PLANE)[:, :, :num_joints_out]
    return out.transpose(0, 2, 1)


if __name__ == "__main__":
    key = jax.random.PRNGKey(0)
    k_param, k_x = jax.random.split(key)

    # Module defaults: num_joints_in=out=27, hidden_feature=256, latent_dim=32.
    B, J_IN, J_OUT = 2, 27, 27
    raw_params = make_generator_params(k_param, num_joints_in=J_IN,
                                       num_joints_out=J_OUT)
    params = prepare_generator_params(raw_params)       # hoisted, runs once

    pose = jax.random.normal(k_x, (B, J_IN, 9), dtype=jnp.float32)

    out = generator_forward(pose, params, num_joints_out=J_OUT)
    out = jax.block_until_ready(out)
    assert out.shape == (B, J_OUT, 9) and out.dtype == jnp.float32
    assert bool(jnp.all(jnp.isfinite(out)))
    print("KERNEL_OK")
</pallas_src>

<mosaic_0001>
module attributes {stable_mosaic.version = 11 : i64} {
  func.func @_generator_kernel(%arg0: i32, %arg1: memref<16x256xbf16, #tpu.memory_space<vmem>>, %arg2: memref<256x256xbf16, #tpu.memory_space<vmem>>, %arg3: memref<1x256xf32, #tpu.memory_space<vmem>>, %arg4: memref<256x256xbf16, #tpu.memory_space<vmem>>, %arg5: memref<1x256xf32, #tpu.memory_space<vmem>>, %arg6: memref<256x256xbf16, #tpu.memory_space<vmem>>, %arg7: memref<1x256xf32, #tpu.memory_space<vmem>>, %arg8: memref<256x256xbf16, #tpu.memory_space<vmem>>, %arg9: memref<1x256xf32, #tpu.memory_space<vmem>>, %arg10: memref<256x256xbf16, #tpu.memory_space<vmem>>, %arg11: memref<1x256xf32, #tpu.memory_space<vmem>>, %arg12: memref<256x768xbf16, #tpu.memory_space<vmem>>, %arg13: memref<1x768xf32, #tpu.memory_space<vmem>>, %arg14: memref<16x1152xf32, #tpu.memory_space<vmem>>) attributes {dimension_semantics = [#tpu.dimension_semantics<parallel>], iteration_bounds = array<i64: 1>, scalar_prefetch = 0 : i64, scratch_operands = 0 : i64, tpu.core_type = #tpu.core_type<tc>, window_params = [{transform_indices = @transform_0, window_bounds = array<i64: 16, 256>}, {pipeline_mode = #tpu.pipeline_mode<synchronous>, transform_indices = @transform_1, window_bounds = array<i64: 256, 256>}, {pipeline_mode = #tpu.pipeline_mode<synchronous>, transform_indices = @transform_2, window_bounds = array<i64: 1, 256>}, {pipeline_mode = #tpu.pipeline_mode<synchronous>, transform_indices = @transform_3, window_bounds = array<i64: 256, 256>}, {pipeline_mode = #tpu.pipeline_mode<synchronous>, transform_indices = @transform_4, window_bounds = array<i64: 1, 256>}, {pipeline_mode = #tpu.pipeline_mode<synchronous>, transform_indices = @transform_5, window_bounds = array<i64: 256, 256>}, {pipeline_mode = #tpu.pipeline_mode<synchronous>, transform_indices = @transform_6, window_bounds = array<i64: 1, 256>}, {pipeline_mode = #tpu.pipeline_mode<synchronous>, transform_indices = @transform_7, window_bounds = array<i64: 256, 256>}, {pipeline_mode = #tpu.pipeline_mode<synchronous>, transform_indices = @transform_8, window_bounds = array<i64: 1, 256>}, {pipeline_mode = #tpu.pipeline_mode<synchronous>, transform_indices = @transform_9, window_bounds = array<i64: 256, 256>}, {pipeline_mode = #tpu.pipeline_mode<synchronous>, transform_indices = @transform_10, window_bounds = array<i64: 1, 256>}, {pipeline_mode = #tpu.pipeline_mode<synchronous>, transform_indices = @transform_11, window_bounds = array<i64: 256, 768>}, {pipeline_mode = #tpu.pipeline_mode<synchronous>, transform_indices = @transform_12, window_bounds = array<i64: 1, 768>}, {transform_indices = @transform_13, window_bounds = array<i64: 16, 1152>}]} {
    %c0 = arith.constant 0 : index
    %c0_0 = arith.constant 0 : index
    %0 = vector.load %arg1[%c0, %c0_0] : memref<16x256xbf16, #tpu.memory_space<vmem>>, vector<16x256xbf16>
    %c0_1 = arith.constant 0 : index
    %c0_2 = arith.constant 0 : index
    %1 = vector.load %arg2[%c0_1, %c0_2] : memref<256x256xbf16, #tpu.memory_space<vmem>>, vector<256x256xbf16>
    %cst = arith.constant dense<0.000000e+00> : vector<16x256xf32>
    %2 = tpu.matmul %0, %1, %cst {dimension_numbers = #tpu.dot_dimension_numbers<[1], [0], [0], [1], [0, 0, 1, 1], [], []>} : vector<16x256xbf16>, vector<256x256xbf16>, vector<16x256xf32> -> vector<16x256xf32>
    %c0_3 = arith.constant 0 : index
    %c0_4 = arith.constant 0 : index
    %3 = vector.load %arg3[%c0_3, %c0_4] : memref<1x256xf32, #tpu.memory_space<vmem>>, vector<1x256xf32>
    %4 = vector.broadcast %3 : vector<1x256xf32> to vector<16x256xf32>
    %5 = arith.addf %2, %4 : vector<16x256xf32>
    %cst_5 = arith.constant 0.000000e+00 : f32
    %6 = vector.broadcast %cst_5 : f32 to vector<16x256xf32>
    %7 = arith.cmpf ogt, %5, %6 : vector<16x256xf32>
    %cst_6 = arith.constant 0.00999999977 : f32
    %8 = vector.broadcast %cst_6 : f32 to vector<16x256xf32>
    %9 = arith.mulf %8, %5 : vector<16x256xf32>
    %10 = arith.select %7, %5, %9 : vector<16x256xi1>, vector<16x256xf32>
    %11 = arith.truncf %10 : vector<16x256xf32> to vector<16x256xbf16>
    %c0_7 = arith.constant 0 : index
    %c0_8 = arith.constant 0 : index
    %12 = vector.load %arg4[%c0_7, %c0_8] : memref<256x256xbf16, #tpu.memory_space<vmem>>, vector<256x256xbf16>
    %cst_9 = arith.constant dense<0.000000e+00> : vector<16x256xf32>
    %13 = tpu.matmul %11, %12, %cst_9 {dimension_numbers = #tpu.dot_dimension_numbers<[1], [0], [0], [1], [0, 0, 1, 1], [], []>} : vector<16x256xbf16>, vector<256x256xbf16>, vector<16x256xf32> -> vector<16x256xf32>
    %c0_10 = arith.constant 0 : index
    %c0_11 = arith.constant 0 : index
    %14 = vector.load %arg5[%c0_10, %c0_11] : memref<1x256xf32, #tpu.memory_space<vmem>>, vector<1x256xf32>
    %15 = vector.broadcast %14 : vector<1x256xf32> to vector<16x256xf32>
    %16 = arith.addf %13, %15 : vector<16x256xf32>
    %17 = arith.truncf %16 : vector<16x256xf32> to vector<16x256xbf16>
    %c0_12 = arith.constant 0 : index
    %c0_13 = arith.constant 0 : index
    %18 = vector.load %arg6[%c0_12, %c0_13] : memref<256x256xbf16, #tpu.memory_space<vmem>>, vector<256x256xbf16>
    %cst_14 = arith.constant dense<0.000000e+00> : vector<16x256xf32>
    %19 = tpu.matmul %17, %18, %cst_14 {dimension_numbers = #tpu.dot_dimension_numbers<[1], [0], [0], [1], [0, 0, 1, 1], [], []>} : vector<16x256xbf16>, vector<256x256xbf16>, vector<16x256xf32> -> vector<16x256xf32>
    %c0_15 = arith.constant 0 : index
    %c0_16 = arith.constant 0 : index
    %20 = vector.load %arg7[%c0_15, %c0_16] : memref<1x256xf32, #tpu.memory_space<vmem>>, vector<1x256xf32>
    %21 = vector.broadcast %20 : vector<1x256xf32> to vector<16x256xf32>
    %22 = arith.addf %19, %21 : vector<16x256xf32>
    %23 = arith.truncf %22 : vector<16x256xf32> to vector<16x256xbf16>
    %c0_17 = arith.constant 0 : index
    %c0_18 = arith.constant 0 : index
    %24 = vector.load %arg8[%c0_17, %c0_18] : memref<256x256xbf16, #tpu.memory_space<vmem>>, vector<256x256xbf16>
    %cst_19 = arith.constant dense<0.000000e+00> : vector<16x256xf32>
    %25 = tpu.matmul %23, %24, %cst_19 {dimension_numbers = #tpu.dot_dimension_numbers<[1], [0], [0], [1], [0, 0, 1, 1], [], []>} : vector<16x256xbf16>, vector<256x256xbf16>, vector<16x256xf32> -> vector<16x256xf32>
    %c0_20 = arith.constant 0 : index
    %c0_21 = arith.constant 0 : index
    %26 = vector.load %arg9[%c0_20, %c0_21] : memref<1x256xf32, #tpu.memory_space<vmem>>, vector<1x256xf32>
    %27 = vector.broadcast %26 : vector<1x256xf32> to vector<16x256xf32>
    %28 = arith.addf %25, %27 : vector<16x256xf32>
    %cst_22 = arith.constant 0.000000e+00 : f32
    %29 = vector.broadcast %cst_22 : f32 to vector<16x256xf32>
    %30 = arith.cmpf ogt, %28, %29 : vector<16x256xf32>
    %cst_23 = arith.constant 0.00999999977 : f32
    %31 = vector.broadcast %cst_23 : f32 to vector<16x256xf32>
    %32 = arith.mulf %31, %28 : vector<16x256xf32>
    %33 = arith.select %30, %28, %32 : vector<16x256xi1>, vector<16x256xf32>
    %34 = arith.truncf %33 : vector<16x256xf32> to vector<16x256xbf16>
    %c0_24 = arith.constant 0 : index
    %c0_25 = arith.constant 0 : index
    %35 = vector.load %arg10[%c0_24, %c0_25] : memref<256x256xbf16, #tpu.memory_space<vmem>>, vector<256x256xbf16>
    %cst_26 = arith.constant dense<0.000000e+00> : vector<16x256xf32>
    %36 = tpu.matmul %34, %35, %cst_26 {dimension_numbers = #tpu.dot_dimension_numbers<[1], [0], [0], [1], [0, 0, 1, 1], [], []>} : vector<16x256xbf16>, vector<256x256xbf16>, vector<16x256xf32> -> vector<16x256xf32>
    %c0_27 = arith.constant 0 : index
    %c0_28 = arith.constant 0 : index
    %37 = vector.load %arg11[%c0_27, %c0_28] : memref<1x256xf32, #tpu.memory_space<vmem>>, vector<1x256xf32>
    %38 = vector.broadcast %37 : vector<1x256xf32> to vector<16x256xf32>
    %39 = arith.addf %36, %38 : vector<16x256xf32>
    %cst_29 = arith.constant 0.000000e+00 : f32
    %40 = vector.broadcast %cst_29 : f32 to vector<16x256xf32>
    %41 = arith.cmpf ogt, %39, %40 : vector<16x256xf32>
    %cst_30 = arith.constant 0.00999999977 : f32
    %42 = vector.broadcast %cst_30 : f32 to vector<16x256xf32>
    %43 = arith.mulf %42, %39 : vector<16x256xf32>
    %44 = arith.select %41, %39, %43 : vector<16x256xi1>, vector<16x256xf32>
    %45 = arith.truncf %44 : vector<16x256xf32> to vector<16x256xbf16>
    %c0_31 = arith.constant 0 : index
    %c0_32 = arith.constant 0 : index
    %46 = vector.load %arg12[%c0_31, %c0_32] : memref<256x768xbf16, #tpu.memory_space<vmem>>, vector<256x768xbf16>
    %cst_33 = arith.constant dense<0.000000e+00> : vector<16x768xf32>
    %47 = tpu.matmul %45, %46, %cst_33 {dimension_numbers = #tpu.dot_dimension_numbers<[1], [0], [0], [1], [0, 0, 1, 1], [], []>} : vector<16x256xbf16>, vector<256x768xbf16>, vector<16x768xf32> -> vector<16x768xf32>
    %c0_34 = arith.constant 0 : index
    %c0_35 = arith.constant 0 : index
    %48 = vector.load %arg13[%c0_34, %c0_35] : memref<1x768xf32, #tpu.memory_space<vmem>>, vector<1x768xf32>
    %49 = vector.broadcast %48 : vector<1x768xf32> to vector<16x768xf32>
    %50 = arith.addf %47, %49 : vector<16x768xf32>
    %51 = vector.extract_strided_slice %50 {offsets = [0, 0], sizes = [16, 128], strides = [1, 1]} : vector<16x768xf32> to vector<16x128xf32>
    %52 = vector.extract_strided_slice %50 {offsets = [0, 128], sizes = [16, 128], strides = [1, 1]} : vector<16x768xf32> to vector<16x128xf32>
    %53 = vector.extract_strided_slice %50 {offsets = [0, 256], sizes = [16, 128], strides = [1, 1]} : vector<16x768xf32> to vector<16x128xf32>
    %54 = vector.extract_strided_slice %50 {offsets = [0, 384], sizes = [16, 128], strides = [1, 1]} : vector<16x768xf32> to vector<16x128xf32>
    %55 = vector.extract_strided_slice %50 {offsets = [0, 512], sizes = [16, 128], strides = [1, 1]} : vector<16x768xf32> to vector<16x128xf32>
    %56 = vector.extract_strided_slice %50 {offsets = [0, 640], sizes = [16, 128], strides = [1, 1]} : vector<16x768xf32> to vector<16x128xf32>
    %57 = arith.mulf %51, %51 : vector<16x128xf32>
    %58 = arith.mulf %52, %52 : vector<16x128xf32>
    %59 = arith.addf %57, %58 : vector<16x128xf32>
    %60 = arith.mulf %53, %53 : vector<16x128xf32>
    %61 = arith.addf %59, %60 : vector<16x128xf32>
    %cst_36 = arith.constant 1.000000e-24 : f32
    %62 = vector.broadcast %cst_36 : f32 to vector<16x128xf32>
    %63 = arith.maximumf %61, %62 : vector<16x128xf32>
    %64 = math.rsqrt %63 : vector<16x128xf32>
    %65 = arith.mulf %51, %64 : vector<16x128xf32>
    %66 = arith.mulf %52, %64 : vector<16x128xf32>
    %67 = arith.mulf %53, %64 : vector<16x128xf32>
    %68 = arith.mulf %65, %54 : vector<16x128xf32>
    %69 = arith.mulf %66, %55 : vector<16x128xf32>
    %70 = arith.addf %68, %69 : vector<16x128xf32>
    %71 = arith.mulf %67, %56 : vector<16x128xf32>
    %72 = arith.addf %70, %71 : vector<16x128xf32>
    %73 = arith.mulf %72, %65 : vector<16x128xf32>
    %74 = arith.subf %54, %73 : vector<16x128xf32>
    %75 = arith.mulf %72, %66 : vector<16x128xf32>
    %76 = arith.subf %55, %75 : vector<16x128xf32>
    %77 = arith.mulf %72, %67 : vector<16x128xf32>
    %78 = arith.subf %56, %77 : vector<16x128xf32>
    %79 = arith.mulf %74, %74 : vector<16x128xf32>
    %80 = arith.mulf %76, %76 : vector<16x128xf32>
    %81 = arith.addf %79, %80 : vector<16x128xf32>
    %82 = arith.mulf %78, %78 : vector<16x128xf32>
    %83 = arith.addf %81, %82 : vector<16x128xf32>
    %cst_37 = arith.constant 1.000000e-24 : f32
    %84 = vector.broadcast %cst_37 : f32 to vector<16x128xf32>
    %85 = arith.maximumf %83, %84 : vector<16x128xf32>
    %86 = math.rsqrt %85 : vector<16x128xf32>
    %87 = arith.mulf %74, %86 : vector<16x128xf32>
    %88 = arith.mulf %76, %86 : vector<16x128xf32>
    %89 = arith.mulf %78, %86 : vector<16x128xf32>
    %90 = arith.mulf %66, %89 : vector<16x128xf32>
    %91 = arith.mulf %67, %88 : vector<16x128xf32>
    %92 = arith.subf %90, %91 : vector<16x128xf32>
    %93 = arith.mulf %67, %87 : vector<16x128xf32>
    %94 = arith.mulf %65, %89 : vector<16x128xf32>
    %95 = arith.subf %93, %94 : vector<16x128xf32>
    %96 = arith.mulf %65, %88 : vector<16x128xf32>
    %97 = arith.mulf %66, %87 : vector<16x128xf32>
    %98 = arith.subf %96, %97 : vector<16x128xf32>
    %99 = tpu.concatenate %65, %87, %92, %66, %88, %95, %67, %89, %98 in 1 : vector<16x128xf32>, vector<16x128xf32>, vector<16x128xf32>, vector<16x128xf32>, vector<16x128xf32>, vector<16x128xf32>, vector<16x128xf32>, vector<16x128xf32>, vector<16x128xf32> -> vector<16x1152xf32>
    %c0_38 = arith.constant 0 : index
    %c0_39 = arith.constant 0 : index
    %100 = vector.load %arg14[%c0_38, %c0_39] : memref<16x1152xf32, #tpu.memory_space<vmem>>, vector<16x1152xf32>
    tpu.vector_store %arg14[%c0_38, %c0_39], %99 {strides = array<i32>} : memref<16x1152xf32, #tpu.memory_space<vmem>>, vector<16x1152xf32>,
    return
  }
  func.func @transform_0(%arg0: i32) -> (i32, i32) {
    %c0_i32 = arith.constant 0 : i32
    %c0_i32_0 = arith.constant 0 : i32
    return %arg0, %c0_i32 : i32, i32
  }
  func.func @transform_1(%arg0: i32) -> (i32, i32) {
    %c0_i32 = arith.constant 0 : i32
    %c0_i32_0 = arith.constant 0 : i32
    %c0_i32_1 = arith.constant 0 : i32
    return %c0_i32, %c0_i32_0 : i32, i32
  }
  func.func @transform_2(%arg0: i32) -> (i32, i32) {
    %c0_i32 = arith.constant 0 : i32
    %c0_i32_0 = arith.constant 0 : i32
    %c0_i32_1 = arith.constant 0 : i32
    return %c0_i32, %c0_i32_0 : i32, i32
  }
  func.func @transform_3(%arg0: i32) -> (i32, i32) {
    %c0_i32 = arith.constant 0 : i32
    %c0_i32_0 = arith.constant 0 : i32
    %c0_i32_1 = arith.constant 0 : i32
    return %c0_i32, %c0_i32_0 : i32, i32
  }
  func.func @transform_4(%arg0: i32) -> (i32, i32) {
    %c0_i32 = arith.constant 0 : i32
    %c0_i32_0 = arith.constant 0 : i32
    %c0_i32_1 = arith.constant 0 : i32
    return %c0_i32, %c0_i32_0 : i32, i32
  }
  func.func @transform_5(%arg0: i32) -> (i32, i32) {
    %c0_i32 = arith.constant 0 : i32
    %c0_i32_0 = arith.constant 0 : i32
    %c0_i32_1 = arith.constant 0 : i32
    return %c0_i32, %c0_i32_0 : i32, i32
  }
  func.func @transform_6(%arg0: i32) -> (i32, i32) {
    %c0_i32 = arith.constant 0 : i32
    %c0_i32_0 = arith.constant 0 : i32
    %c0_i32_1 = arith.constant 0 : i32
    return %c0_i32, %c0_i32_0 : i32, i32
  }
  func.func @transform_7(%arg0: i32) -> (i32, i32) {
    %c0_i32 = arith.constant 0 : i32
    %c0_i32_0 = arith.constant 0 : i32
    %c0_i32_1 = arith.constant 0 : i32
    return %c0_i32, %c0_i32_0 : i32, i32
  }
  func.func @transform_8(%arg0: i32) -> (i32, i32) {
    %c0_i32 = arith.constant 0 : i32
    %c0_i32_0 = arith.constant 0 : i32
    %c0_i32_1 = arith.constant 0 : i32
    return %c0_i32, %c0_i32_0 : i32, i32
  }
  func.func @transform_9(%arg0: i32) -> (i32, i32) {
    %c0_i32 = arith.constant 0 : i32
    %c0_i32_0 = arith.constant 0 : i32
    %c0_i32_1 = arith.constant 0 : i32
    return %c0_i32, %c0_i32_0 : i32, i32
  }
  func.func @transform_10(%arg0: i32) -> (i32, i32) {
    %c0_i32 = arith.constant 0 : i32
    %c0_i32_0 = arith.constant 0 : i32
    %c0_i32_1 = arith.constant 0 : i32
    return %c0_i32, %c0_i32_0 : i32, i32
  }
  func.func @transform_11(%arg0: i32) -> (i32, i32) {
    %c0_i32 = arith.constant 0 : i32
    %c0_i32_0 = arith.constant 0 : i32
    %c0_i32_1 = arith.constant 0 : i32
    return %c0_i32, %c0_i32_0 : i32, i32
  }
  func.func @transform_12(%arg0: i32) -> (i32, i32) {
    %c0_i32 = arith.constant 0 : i32
    %c0_i32_0 = arith.constant 0 : i32
    %c0_i32_1 = arith.constant 0 : i32
    return %c0_i32, %c0_i32_0 : i32, i32
  }
  func.func @transform_13(%arg0: i32) -> (i32, i32) {
    %c0_i32 = arith.constant 0 : i32
    %c0_i32_0 = arith.constant 0 : i32
    return %arg0, %c0_i32 : i32, i32
  }
}

</mosaic_0001>

<bundles_post_ra>
// kernel: generator_forward.1
= control target key start
LH: loop header
LB: loop body
LE: loop exit
PB: predicated region body
PF: predicated region fallthrough
CT: control target
= control target key end

     0   :  { %18 = vsyncpa [#allocation3], 0  ;;  %s3402_s0 = inlined_call_operand.vmem [shape: bf16[16,256], index: 0, kind: input, shape index: {}]   ;;  %s3403_s1 = inlined_call_operand.hbm [shape: bf16[256,256], index: 1, kind: input, shape index: {}]   ;;  %s3404_s2 = inlined_call_operand.vmem [shape: f32[1,256], index: 2, kind: input, shape index: {}]   ;;  %s3405_s3 = inlined_call_operand.hbm [shape: bf16[256,256], index: 3, kind: input, shape index: {}]   ;;  %s3406_s4 = inlined_call_operand.vmem [shape: f32[1,256], index: 4, kind: input, shape index: {}]   ;;  %s3407_s5 = inlined_call_operand.hbm [shape: bf16[256,256], index: 5, kind: input, shape index: {}]   ;;  %s3408_s6 = inlined_call_operand.vmem [shape: f32[1,256], index: 6, kind: input, shape index: {}]   ;;  %s3409_s7 = inlined_call_operand.hbm [shape: bf16[256,256], index: 7, kind: input, shape index: {}]   ;;  %s3410_s8 = inlined_call_operand.vmem [shape: f32[1,256], index: 8, kind: input, shape index: {}]   ;;  %s3411_s9 = inlined_call_operand.hbm [shape: bf16[256,256], index: 9, kind: input, shape index: {}]   ;;  %s3412_s10 = inlined_call_operand.vmem [shape: f32[1,256], index: 10, kind: input, shape index: {}]   ;;  %s3413_s11 = inlined_call_operand.hbm [shape: bf16[256,768], index: 11, kind: input, shape index: {}]   ;;  %s3414_s12 = inlined_call_operand.vmem [shape: f32[1,768], index: 12, kind: input, shape index: {}]   ;;  %s3415_s13 = inlined_call_operand.vmem [shape: f32[16,1152], index: 13, kind: output, shape index: {}]  }
   0x1   :  { %19 = vsyncpa [#allocation5], 0 }
   0x2   :  { %20 = vsyncpa [#allocation8], 0 }
   0x3   :  { %21 = vsyncpa [#allocation11], 0  ;;  %s3065_s25 = smov [#allocation4]   ;;  %s3066_s27 = smov [#allocation7]  }
   0x4   :  { %s43_s26 = sshll.u32 %s3065_s25, 4  ;;  %s71_s28 = sshll.u32 %s3066_s27, 4  ;;  %s44_s26 = int_to_ptr.vmem [resolvable:$true] %s43_s26  ;;  %s3145_s28 = int_to_ptr.vmem [resolvable:$true] %s71_s28 }
   0x5   :  { %s2925_s14 = scalar_lea.hbm %s3405_s3, 4096 }
   0x6   :  { %p2926_p0 = scmp.ne.s32.totalorder %s3405_s3, %s2925_s14  ;;  %p2929_p1 = scmp.lt.u32.totalorder %s2925_s14, %s3405_s3 }
   0x8   :  { %p2931_p2 = pnand %p2929_p1, %p2926_p0 }
   0xa   :  { %2934 = shalt.err (!%p2931_p2)
}
   0xb   :  { %s2935_s19 = scalar_lea.vmem %s44_s26, 4096  ;;  %p2940_p4 = scmp.lt.s32.totalorder %s44_s26, %s44_s26 }
   0xc   :  { %p2936_p3 = scmp.ne.s32.totalorder %s44_s26, %s2935_s19  ;;  %p2941_p5 = scmp.lt.s32.totalorder %s2935_s19, %s2935_s19 }
   0xe   :  { %p2942_p6 = por %p2941_p5, %p2940_p4 }
  0x10   :  { %p2943_p7 = pnand %p2942_p6, %p2936_p3 }
  0x12   :  { %2946 = shalt.err (!%p2943_p7)
}
  0x13   :  { %s3067_s20 = smov 128   ;;  %s3068_s21 = smov 8  }
  0x14   :  { %49 = dma.hbm_to_vmem [thread:$0]  %s3405_s3, 4096, %s44_s26, [#allocation5], %s3067_s20, %s3067_s20, %s3068_s21  }
  0x15   :  { %s2947_s27 = scalar_lea.hbm %s3409_s7, 4096 }
  0x16   :  { %p2948_p8 = scmp.ne.s32.totalorder %s3409_s7, %s2947_s27  ;;  %p2951_p9 = scmp.lt.u32.totalorder %s2947_s27, %s3409_s7 }
  0x18   :  { %p2953_p10 = pnand %p2951_p9, %p2948_p8 }
  0x1a   :  { %2956 = shalt.err (!%p2953_p10)
}
  0x1b   :  { %s2957_s16 = scalar_lea.vmem %s3145_s28, 4096  ;;  %p2962_p12 = scmp.lt.s32.totalorder %s3145_s28, %s3145_s28 }
  0x1c   :  { %p2958_p11 = scmp.ne.s32.totalorder %s3145_s28, %s2957_s16  ;;  %p2963_p13 = scmp.lt.s32.totalorder %s2957_s16, %s2957_s16 }
  0x1e   :  { %p2964_p0 = por %p2963_p13, %p2962_p12 }
  0x20   :  { %p2965_p1 = pnand %p2964_p0, %p2958_p11 }
  0x22   :  { %2968 = shalt.err (!%p2965_p1)
}
  0x23   :  { %77 = dma.hbm_to_vmem [thread:$0]  %s3409_s7, 4096, %s3145_s28, [#allocation8], %s3067_s20, %s3067_s20, %s3068_s21  }
  0x24   :  { %s3069_s17 = smov [#allocation2]   ;;  %s3070_s19 = smov [#allocation6]  }
  0x25   :  { %s29_s18 = sshll.u32 %s3069_s17, 4  ;;  %s57_s22 = sshll.u32 %s3070_s19, 4  ;;  %s30_s18 = int_to_ptr.vmem [resolvable:$true] %s29_s18  ;;  %s3182_s22 = int_to_ptr.vmem [resolvable:$true] %s57_s22 }
  0x26   :  { %s2969_s25 = scalar_lea.hbm %s3403_s1, 4096 }
  0x27   :  { %p2970_p2 = scmp.ne.s32.totalorder %s3403_s1, %s2969_s25  ;;  %p2973_p3 = scmp.lt.u32.totalorder %s2969_s25, %s3403_s1 }
  0x29   :  { %p2975_p4 = pnand %p2973_p3, %p2970_p2 }
  0x2b   :  { %2978 = shalt.err (!%p2975_p4)
}
  0x2c   :  { %s2979_s7 = scalar_lea.vmem %s30_s18, 4096  ;;  %p2984_p6 = scmp.lt.s32.totalorder %s30_s18, %s30_s18 }
  0x2d   :  { %p2980_p5 = scmp.ne.s32.totalorder %s30_s18, %s2979_s7  ;;  %p2985_p7 = scmp.lt.s32.totalorder %s2979_s7, %s2979_s7 }
  0x2f   :  { %p2986_p8 = por %p2985_p7, %p2984_p6 }
  0x31   :  { %p2987_p9 = pnand %p2986_p8, %p2980_p5 }
  0x33   :  { %2990 = shalt.err (!%p2987_p9)
}
  0x34   :  { %35 = dma.hbm_to_vmem [thread:$0]  %s3403_s1, 4096, %s30_s18, [#allocation3], %s3067_s20, %s3067_s20, %s3068_s21  }
  0x35   :  { %s2991_s26 = scalar_lea.hbm %s3407_s5, 4096 }
  0x36   :  { %p2992_p10 = scmp.ne.s32.totalorder %s3407_s5, %s2991_s26  ;;  %p2995_p11 = scmp.lt.u32.totalorder %s2991_s26, %s3407_s5 }
  0x38   :  { %p2997_p12 = pnand %p2995_p11, %p2992_p10 }
  0x3a   :  { %3000 = shalt.err (!%p2997_p12)
}
  0x3b   :  { %s3001_s25 = scalar_lea.vmem %s3182_s22, 4096  ;;  %p3006_p0 = scmp.lt.s32.totalorder %s3182_s22, %s3182_s22 }
  0x3c   :  { %p3002_p13 = scmp.ne.s32.totalorder %s3182_s22, %s3001_s25  ;;  %p3007_p1 = scmp.lt.s32.totalorder %s3001_s25, %s3001_s25 }
  0x3e   :  { %p3008_p2 = por %p3007_p1, %p3006_p0 }
  0x40   :  { %p3009_p3 = pnand %p3008_p2, %p3002_p13 }
  0x42   :  { %3012 = shalt.err (!%p3009_p3)
}
  0x43   :  { %63 = dma.hbm_to_vmem [thread:$0]  %s3407_s5, 4096, %s3182_s22, [#allocation5], %s3067_s20, %s3067_s20, %s3068_s21  }
  0x44   :  { %s3071_s27 = smov [#allocation9]   ;;  %s3072_s30 = smov [#allocation10]  }
  0x45   :  { %s85_s29 = sshll.u32 %s3071_s27, 4  ;;  %s99_s14 = sshll.u32 %s3072_s30, 4  ;;  %s86_s29 = int_to_ptr.vmem [resolvable:$true] %s85_s29  ;;  %s3219_s14 = int_to_ptr.vmem [resolvable:$true] %s99_s14 }
  0x46   :  { %s3013_s15 = scalar_lea.hbm %s3411_s9, 4096 }
  0x47   :  { %p3014_p4 = scmp.ne.s32.totalorder %s3411_s9, %s3013_s15  ;;  %p3017_p5 = scmp.lt.u32.totalorder %s3013_s15, %s3411_s9 }
  0x49   :  { %p3019_p6 = pnand %p3017_p5, %p3014_p4 }
  0x4b   :  { %3022 = shalt.err (!%p3019_p6)
}
  0x4c   :  { %s3023_s5 = scalar_lea.vmem %s86_s29, 4096  ;;  %p3028_p8 = scmp.lt.s32.totalorder %s86_s29, %s86_s29 }
  0x4d   :  { %p3024_p7 = scmp.ne.s32.totalorder %s86_s29, %s3023_s5  ;;  %p3029_p9 = scmp.lt.s32.totalorder %s3023_s5, %s3023_s5 }
  0x4f   :  { %p3030_p10 = por %p3029_p9, %p3028_p8 }
  0x51   :  { %p3031_p11 = pnand %p3030_p10, %p3024_p7 }
  0x53   :  { %3034 = shalt.err (!%p3031_p11)
}
  0x54   :  { %91 = dma.hbm_to_vmem [thread:$0]  %s3411_s9, 4096, %s86_s29, [#allocation8], %s3067_s20, %s3067_s20, %s3068_s21  }
  0x55   :  { %s3035_s25 = scalar_lea.hbm %s3413_s11, 12288 }
  0x56   :  { %p3036_p12 = scmp.ne.s32.totalorder %s3413_s11, %s3035_s25  ;;  %p3039_p13 = scmp.lt.u32.totalorder %s3035_s25, %s3413_s11 }
  0x58   :  { %p3041_p0 = pnand %p3039_p13, %p3036_p12 }
  0x5a   :  { %3044 = shalt.err (!%p3041_p0)
}
  0x5b   :  { %s3045_s7 = scalar_lea.vmem %s3219_s14, 12288  ;;  %p3050_p2 = scmp.lt.s32.totalorder %s3219_s14, %s3219_s14 }
  0x5c   :  { %p3046_p1 = scmp.ne.s32.totalorder %s3219_s14, %s3045_s7  ;;  %p3051_p3 = scmp.lt.s32.totalorder %s3045_s7, %s3045_s7 }
  0x5e   :  { %p3052_p4 = por %p3051_p3, %p3050_p2 }
  0x60   :  { %p3053_p5 = pnand %p3052_p4, %p3046_p1 }
  0x62   :  { %3056 = shalt.err (!%p3053_p5)
}
  0x63   :  { %s3073_s9 = smov 384   ;;  %s3074_s20 = smov 24  }
  0x64   :  { %105 = dma.hbm_to_vmem [thread:$0]  %s3413_s11, 12288, %s3219_s14, [#allocation11], %s3073_s9, %s3073_s9, %s3074_s20  }
  0x65   :  { %3057 = dma.done.wait [#allocation3], 4096  }
  0x66   :  { %3058 = vsyncadd [#allocation3], 4294963200 }
  0x67   :  { %3059 = dma.done.wait [#allocation5], 8192  }
  0x68   :  { %3060 = vsyncadd [#allocation5], 4294959104 }
  0x69   :  { %3061 = dma.done.wait [#allocation8], 8192  }
  0x6a   :  { %3062 = vsyncadd [#allocation8], 4294959104 }
  0x6b   :  { %3063 = dma.done.wait [#allocation11], 12288  }
  0x6c   :  { %3064 = vsyncadd [#allocation11], 4294955008  ;;  %v2530_v0 = vld [vmem:[#allocation2 + $0x4] ss:$8 sps:$4 sm:$0xff]   ;;  %v2532_v1 = vld [vmem:[#allocation2] ss:$8 sps:$4 sm:$0xff]  }
  0x6d   :  { %342 = vmatprep.subr.bf16.mxu0 %v2530_v0  ;;  %v2533_v2 = vld [vmem:[#allocation2 + $0x14] ss:$8 sps:$4 sm:$0xff]   ;;  %v2535_v3 = vld [vmem:[#allocation2 + $0x10] ss:$8 sps:$4 sm:$0xff]   ;;  %v2536_v4 = vld [vmem:[#allocation2 + $0x24] ss:$8 sps:$4 sm:$0xff]  }
  0x6e   :  { %343 = vmatpush1.bf16.msra.mxu0 %v2532_v1  ;;  %v2538_v5 = vld [vmem:[#allocation2 + $0x20] ss:$8 sps:$4 sm:$0xff]   ;;  %v2539_v6 = vld [vmem:[#allocation2 + $0x34] ss:$8 sps:$4 sm:$0xff]   ;;  %v2541_v7 = vld [vmem:[#allocation2 + $0x30] ss:$8 sps:$4 sm:$0xff]  }
  0x6f   :  { %344 = vmatprep.subr.bf16.mxu0 %v2533_v2  ;;  %v2542_v8 = vld [vmem:[#allocation2 + $0x44] ss:$8 sps:$4 sm:$0xff]   ;;  %v2544_v9 = vld [vmem:[#allocation2 + $0x40] ss:$8 sps:$4 sm:$0xff]   ;;  %v2545_v10 = vld [vmem:[#allocation2 + $0x54] ss:$8 sps:$4 sm:$0xff]  }
  0x70   :  { %v2547_v11 = vld [vmem:[#allocation2 + $0x50] ss:$8 sps:$4 sm:$0xff]   ;;  %v2548_v12 = vld [vmem:[#allocation2 + $0x64] ss:$8 sps:$4 sm:$0xff]   ;;  %v2550_v13 = vld [vmem:[#allocation2 + $0x60] ss:$8 sps:$4 sm:$0xff]  }
  0x71   :  { %v2551_v14 = vld [vmem:[#allocation2 + $0x74] ss:$8 sps:$4 sm:$0xff]   ;;  %v2580_v15 = vld [vmem:[%s3402_s0 + $0x4] ss:$8 sps:$4 sm:$0xff]   ;;  %v2583_v17 = vld [vmem:[#allocation4] ss:$8 sps:$4 sm:$0xff]  }
  0x72   :  { %345 = vmatpush1.bf16.msra.mxu0 %v2535_v3  ;;  %v2581_v16 = vld [vmem:[#allocation4 + $0x4] ss:$8 sps:$4 sm:$0xff]   ;;  %374 = vmatprep.mubr.bf16.mxu0 %v2580_v15  ;;  %v2584_v18 = vld [vmem:[#allocation4 + $0x14] ss:$8 sps:$4 sm:$0xff]   ;;  %v2586_v19 = vld [vmem:[#allocation4 + $0x10] ss:$8 sps:$4 sm:$0xff]  }
  0x73   :  { %346 = vmatprep.subr.bf16.mxu0 %v2536_v4  ;;  %603 = vmatprep.subr.bf16.mxu1 %v2581_v16  ;;  %v2553_v20 = vld [vmem:[#allocation2 + $0x70] ss:$8 sps:$4 sm:$0xff]   ;;  %v2587_v21 = vld [vmem:[#allocation4 + $0x24] ss:$8 sps:$4 sm:$0xff]   ;;  %v2589_v23 = vld [vmem:[#allocation4 + $0x20] ss:$8 sps:$4 sm:$0xff]  }
  0x74   :  { %604 = vmatpush1.bf16.msra.mxu1 %v2583_v17  ;;  %v2554_v22 = vld [vmem:[#allocation2 + $0x84] ss:$8 sps:$4 sm:$0xff]   ;;  %v2556_v24 = vld [vmem:[#allocation2 + $0x80] ss:$8 sps:$4 sm:$0xff]   ;;  %v2590_v25 = vld [vmem:[#allocation4 + $0x34] ss:$8 sps:$4 sm:$0xff]  }
  0x75   :  { %605 = vmatprep.subr.bf16.mxu1 %v2584_v18  ;;  %v2557_v26 = vld [vmem:[#allocation2 + $0x94] ss:$8 sps:$4 sm:$0xff]   ;;  %v2592_v27 = vld [vmem:[#allocation4 + $0x30] ss:$8 sps:$4 sm:$0xff]   ;;  %v2593_v29 = vld [vmem:[#allocation4 + $0x44] ss:$8 sps:$4 sm:$0xff]  }
  0x76   :  { %347 = vmatpush1.bf16.msra.mxu0 %v2538_v5  ;;  %v2559_v28 = vld [vmem:[#allocation2 + $0x90] ss:$8 sps:$4 sm:$0xff]   ;;  %v2560_v30 = vld [vmem:[#allocation2 + $0xa4] ss:$8 sps:$4 sm:$0xff]   ;;  %v2562_v31 = vld [vmem:[#allocation2 + $0xa0] ss:$8 sps:$4 sm:$0xff]  }
  0x77   :  { %348 = vmatprep.subr.bf16.mxu0 %v2539_v6  ;;  %v2595_v32 = vld [vmem:[#allocation4 + $0x40] ss:$8 sps:$4 sm:$0xff]   ;;  %v2563_v33 = vld [vmem:[#allocation2 + $0xb4] ss:$8 sps:$4 sm:$0xff]   ;;  %v2598_v35 = vld [vmem:[#allocation4 + $0x50] ss:$8 sps:$4 sm:$0xff]  }
  0x78   :  { %606 = vmatpush1.bf16.msra.mxu1 %v2586_v19  ;;  %v2596_v34 = vld [vmem:[#allocation4 + $0x54] ss:$8 sps:$4 sm:$0xff]   ;;  %v2565_v36 = vld [vmem:[#allocation2 + $0xb0] ss:$8 sps:$4 sm:$0xff]   ;;  %v2599_v37 = vld [vmem:[#allocation4 + $0x64] ss:$8 sps:$4 sm:$0xff]  }
  0x79   :  { %607 = vmatprep.subr.bf16.mxu1 %v2587_v21  ;;  %v2566_v38 = vld [vmem:[#allocation2 + $0xc4] ss:$8 sps:$4 sm:$0xff]   ;;  %v2601_v39 = vld [vmem:[#allocation4 + $0x60] ss:$8 sps:$4 sm:$0xff]   ;;  %v2602_v41 = vld [vmem:[#allocation4 + $0x74] ss:$8 sps:$4 sm:$0xff]  }
  0x7a   :  { %349 = vmatpush1.bf16.msra.mxu0 %v2541_v7  ;;  %v2568_v40 = vld [vmem:[#allocation2 + $0xc0] ss:$8 sps:$4 sm:$0xff]   ;;  %v2569_v42 = vld [vmem:[#allocation2 + $0xd4] ss:$8 sps:$4 sm:$0xff]   ;;  %v2604_v43 = vld [vmem:[#allocation4 + $0x70] ss:$8 sps:$4 sm:$0xff]  }
  0x7b   :  { %350 = vmatprep.subr.bf16.mxu0 %v2542_v8  ;;  %v2571_v44 = vld [vmem:[#allocation2 + $0xd0] ss:$8 sps:$4 sm:$0xff]   ;;  %v2605_v45 = vld [vmem:[#allocation4 + $0x84] ss:$8 sps:$4 sm:$0xff]   ;;  %v2607_v47 = vld [vmem:[#allocation4 + $0x80] ss:$8 sps:$4 sm:$0xff]  }
  0x7c   :  { %608 = vmatpush1.bf16.msra.mxu1 %v2589_v23  ;;  %v2572_v46 = vld [vmem:[#allocation2 + $0xe4] ss:$8 sps:$4 sm:$0xff]   ;;  %v2574_v48 = vld [vmem:[#allocation2 + $0xe0] ss:$8 sps:$4 sm:$0xff]   ;;  %v2608_v49 = vld [vmem:[#allocation4 + $0x94] ss:$8 sps:$4 sm:$0xff]  }
  0x7d   :  { %609 = vmatprep.subr.bf16.mxu1 %v2590_v25  ;;  %v2575_v50 = vld [vmem:[#allocation2 + $0xf4] ss:$8 sps:$4 sm:$0xff]   ;;  %v2610_v51 = vld [vmem:[#allocation4 + $0x90] ss:$8 sps:$4 sm:$0xff]   ;;  %v2611_v53 = vld [vmem:[#allocation4 + $0xa4] ss:$8 sps:$4 sm:$0xff]  }
  0x7e   :  { %351 = vmatpush1.bf16.msra.mxu0 %v2544_v9  ;;  %v2577_v52 = vld [vmem:[#allocation2 + $0xf0] ss:$8 sps:$4 sm:$0xff]   ;;  %v2578_v54 = vld [vmem:[%s3402_s0] ss:$8 sps:$4 sm:$0xff]   ;;  %v2614_v56 = vld [vmem:[#allocation4 + $0xb4] ss:$8 sps:$4 sm:$0xff]  }
  0x7f   :  { %352 = vmatprep.subr.bf16.mxu0 %v2545_v10  ;;  %v2613_v55 = vld [vmem:[#allocation4 + $0xa0] ss:$8 sps:$4 sm:$0xff]   ;;  %v2616_v57 = vld [vmem:[#allocation4 + $0xb0] ss:$8 sps:$4 sm:$0xff]   ;;  %v2617_v58 = vld [vmem:[#allocation4 + $0xc4] ss:$8 sps:$4 sm:$0xff]  }
  0x80   :  { %610 = vmatpush1.bf16.msra.mxu1 %v2592_v27  ;;  %v2619_v59 = vld [vmem:[#allocation4 + $0xc0] ss:$8 sps:$4 sm:$0xff]   ;;  %v2620_v60 = vld [vmem:[#allocation4 + $0xd4] ss:$8 sps:$4 sm:$0xff]   ;;  %v2622_v61 = vld [vmem:[#allocation4 + $0xd0] ss:$8 sps:$4 sm:$0xff]  }
  0x81   :  { %611 = vmatprep.subr.bf16.mxu1 %v2593_v29  ;;  %v2623_v62 = vld [vmem:[#allocation4 + $0xe4] ss:$8 sps:$4 sm:$0xff]   ;;  %v2625_v63 = vld [vmem:[#allocation4 + $0xe0] ss:$8 sps:$4 sm:$0xff]   ;;  %v2626_v0 = vld [vmem:[#allocation4 + $0xf4] ss:$8 sps:$4 sm:$0xff]  }
  0x82   :  { %353 = vmatpush1.bf16.msra.mxu0 %v2547_v11  ;;  %v2628_v1 = vld [vmem:[#allocation4 + $0xf0] ss:$8 sps:$4 sm:$0xff]   ;;  %v2629_v2 = vld [vmem:[#allocation6] ss:$8 sps:$4 sm:$0xff]   ;;  %v2631_v3 = vld [vmem:[#allocation6 + $0x4] ss:$8 sps:$4 sm:$0xff]  }
  0x83   :  { %354 = vmatprep.subr.bf16.mxu0 %v2548_v12  ;;  %v2634_v4 = vld [vmem:[#allocation6 + $0x14] ss:$8 sps:$4 sm:$0xff]   ;;  %v2632_v5 = vld [vmem:[#allocation6 + $0x10] ss:$8 sps:$4 sm:$0xff]   ;;  %v2637_v6 = vld [vmem:[#allocation6 + $0x24] ss:$8 sps:$4 sm:$0xff]  }
  0x84   :  { %612 = vmatpush1.bf16.msra.mxu1 %v2595_v32  ;;  %v2635_v7 = vld [vmem:[#allocation6 + $0x20] ss:$8 sps:$4 sm:$0xff]   ;;  %v2640_v8 = vld [vmem:[#allocation6 + $0x34] ss:$8 sps:$4 sm:$0xff]   ;;  %v2638_v9 = vld [vmem:[#allocation6 + $0x30] ss:$8 sps:$4 sm:$0xff]  }
  0x85   :  { %613 = vmatprep.subr.bf16.mxu1 %v2596_v34  ;;  %v2643_v10 = vld [vmem:[#allocation6 + $0x44] ss:$8 sps:$4 sm:$0xff]   ;;  %v2641_v11 = vld [vmem:[#allocation6 + $0x40] ss:$8 sps:$4 sm:$0xff]   ;;  %v2646_v12 = vld [vmem:[#allocation6 + $0x54] ss:$8 sps:$4 sm:$0xff]  }
  0x86   :  { %355 = vmatpush1.bf16.msra.mxu0 %v2550_v13  ;;  %v2644_v13 = vld [vmem:[#allocation6 + $0x50] ss:$8 sps:$4 sm:$0xff]   ;;  %v2647_v15 = vld [vmem:[#allocation6 + $0x60] ss:$8 sps:$4 sm:$0xff]   ;;  %v2652_v16 = vld [vmem:[#allocation6 + $0x74] ss:$8 sps:$4 sm:$0xff]  }
  0x87   :  { %356 = vmatprep.subr.bf16.mxu0 %v2551_v14  ;;  %v2649_v14 = vld [vmem:[#allocation6 + $0x64] ss:$8 sps:$4 sm:$0xff]   ;;  %v2650_v17 = vld [vmem:[#allocation6 + $0x70] ss:$8 sps:$4 sm:$0xff]   ;;  %v2653_v19 = vld [vmem:[#allocation6 + $0x80] ss:$8 sps:$4 sm:$0xff]  }
  0x88   :  { %614 = vmatpush1.bf16.msra.mxu1 %v2598_v35  ;;  %v2655_v18 = vld [vmem:[#allocation6 + $0x84] ss:$8 sps:$4 sm:$0xff]   ;;  %v2656_v21 = vld [vmem:[#allocation6 + $0x90] ss:$8 sps:$4 sm:$0xff]   ;;  %v2659_v23 = vld [vmem:[#allocation6 + $0xa0] ss:$8 sps:$4 sm:$0xff]  }
  0x89   :  { %615 = vmatprep.subr.bf16.mxu1 %v2599_v37  ;;  %v2662_v25 = vld [vmem:[#allocation6 + $0xb0] ss:$8 sps:$4 sm:$0xff]   ;;  %v2665_v27 = vld [vmem:[#allocation6 + $0xc0] ss:$8 sps:$4 sm:$0xff]  }
  0x8a   :  { %357 = vmatpush1.bf16.msra.mxu0 %v2553_v20  ;;  %v2658_v20 = vld [vmem:[#allocation6 + $0x94] ss:$8 sps:$4 sm:$0xff]   ;;  %v2668_v29 = vld [vmem:[#allocation6 + $0xd0] ss:$8 sps:$4 sm:$0xff]  }
  0x8b   :  { %358 = vmatprep.subr.bf16.mxu0 %v2554_v22  ;;  %v2661_v22 = vld [vmem:[#allocation6 + $0xa4] ss:$8 sps:$4 sm:$0xff]  }
  0x8c   :  { %616 = vmatpush1.bf16.msra.mxu1 %v2601_v39 }
  0x8d   :  { %617 = vmatprep.subr.bf16.mxu1 %v2602_v41 }
  0x8e   :  { %359 = vmatpush1.bf16.msra.mxu0 %v2556_v24  ;;  %v2664_v24 = vld [vmem:[#allocation6 + $0xb4] ss:$8 sps:$4 sm:$0xff]  }
  0x8f   :  { %360 = vmatprep.subr.bf16.mxu0 %v2557_v26  ;;  %v2667_v26 = vld [vmem:[#allocation6 + $0xc4] ss:$8 sps:$4 sm:$0xff]  }
  0x90   :  { %618 = vmatpush1.bf16.msra.mxu1 %v2604_v43 }
  0x91   :  { %619 = vmatprep.subr.bf16.mxu1 %v2605_v45 }
  0x92   :  { %361 = vmatpush1.bf16.msra.mxu0 %v2559_v28  ;;  %v2670_v28 = vld [vmem:[#allocation6 + $0xd4] ss:$8 sps:$4 sm:$0xff]  }
  0x93   :  { %362 = vmatprep.subr.bf16.mxu0 %v2560_v30  ;;  %v162_v30 = vlaneseq }
  0x94   :  { %620 = vmatpush1.bf16.msra.mxu1 %v2607_v47 }
  0x95   :  { %621 = vmatprep.subr.bf16.mxu1 %v2608_v49 }
  0x96   :  { %363 = vmatpush1.bf16.msra.mxu0 %v2562_v31  ;;  %v3259_v31 = vshrl.u32 %v162_v30, 7 }
  0x97   :  { %364 = vmatprep.subr.bf16.mxu0 %v2563_v33  ;;  %v160_v33 = vld [vmem:[%s3404_s2] sm:$0x3] }
  0x98   :  { %622 = vmatpush1.bf16.msra.mxu1 %v2610_v51  ;;  %v3262_v32 = vsub.s32 0, %v3259_v31  ;;  %v3268_v34 = vsub.s32 1, %v3259_v31 }
  0x99   :  { %623 = vmatprep.subr.bf16.mxu1 %v2611_v53 }
  0x9a   :  { %365 = vmatpush1.bf16.msra.mxu0 %v2565_v36  ;;  %v165_v35 = vrot.slane %v160_v33, %v3262_v32  ;;  %v169_v36 = vrot.slane %v160_v33, %v3268_v34 }
  0x9b   :  { %366 = vmatprep.subr.bf16.mxu0 %v2566_v38 }
  0x9c   :  { %624 = vmatpush1.bf16.msra.mxu1 %v2613_v55  ;;  %v2673_v55 = vld [vmem:[#allocation6 + $0xe4] ss:$8 sps:$4 sm:$0xff]  }
  0x9d   :  { %625 = vmatprep.subr.bf16.mxu1 %v2614_v56  ;;  %v2671_v56 = vld [vmem:[#allocation6 + $0xe0] ss:$8 sps:$4 sm:$0xff]  }
  0x9e   :  { %367 = vmatpush1.bf16.msra.mxu0 %v2568_v40 }
  0x9f   :  { %368 = vmatprep.subr.bf16.mxu0 %v2569_v42 }
  0xa0   :  { %626 = vmatpush1.bf16.msra.mxu1 %v2616_v57  ;;  %v2676_v57 = vld [vmem:[#allocation6 + $0xf4] ss:$8 sps:$4 sm:$0xff]  }
  0xa1   :  { %627 = vmatprep.subr.bf16.mxu1 %v2617_v58  ;;  %v2674_v58 = vld [vmem:[#allocation6 + $0xf0] ss:$8 sps:$4 sm:$0xff]  }
  0xa2   :  { %369 = vmatpush1.bf16.msra.mxu0 %v2571_v44 }
  0xa3   :  { %370 = vmatprep.subr.bf16.mxu0 %v2572_v46 }
  0xa4   :  { %628 = vmatpush1.bf16.msra.mxu1 %v2619_v59  ;;  %v2677_v59 = vld [vmem:[#allocation7] ss:$8 sps:$4 sm:$0xff]  }
  0xa5   :  { %629 = vmatprep.subr.bf16.mxu1 %v2620_v60  ;;  %v2679_v60 = vld [vmem:[#allocation7 + $0x4] ss:$8 sps:$4 sm:$0xff]  }
  0xa6   :  { %371 = vmatpush1.bf16.msra.mxu0 %v2574_v48 }
  0xa7   :  { %372 = vmatprep.subr.bf16.mxu0 %v2575_v50 }
  0xa8   :  { %630 = vmatpush1.bf16.msra.mxu1 %v2622_v61  ;;  %v2682_v61 = vld [vmem:[#allocation7 + $0x14] ss:$8 sps:$4 sm:$0xff]  }
  0xa9   :  { %631 = vmatprep.subr.bf16.mxu1 %v2623_v62  ;;  %v2680_v62 = vld [vmem:[#allocation7 + $0x10] ss:$8 sps:$4 sm:$0xff]  }
  0xaa   :  { %373 = vmatpush1.bf16.msra.mxu0 %v2577_v52 }
  0xab   :  { %852 = vmatprep.subr.bf16.mxu0 %v2631_v3  ;;  %v2691_v3 = vld [vmem:[#allocation7 + $0x44] ss:$8 sps:$4 sm:$0xff]  }
  0xac   :  { %632 = vmatpush1.bf16.msra.mxu1 %v2625_v63  ;;  %v2685_v63 = vld [vmem:[#allocation7 + $0x24] ss:$8 sps:$4 sm:$0xff]  }
  0xad   :  { %375 = vmatmul.mubr.bf16.vlgmr.msra.gmra.mrb[0].mxu0 %v2578_v54  ;;  %633 = vmatprep.subr.bf16.mxu1 %v2626_v0  ;;  %v2683_v0 = vld [vmem:[#allocation7 + $0x20] ss:$8 sps:$4 sm:$0xff]  }
  0xae   :  { %853 = vmatpush1.bf16.msra.mxu0 %v2629_v2  ;;  %v2686_v2 = vld [vmem:[#allocation7 + $0x30] ss:$8 sps:$4 sm:$0xff]  }
  0xaf   :  { %854 = vmatprep.subr.bf16.mxu0 %v2634_v4  ;;  %v2689_v4 = vld [vmem:[#allocation7 + $0x40] ss:$8 sps:$4 sm:$0xff]  }
  0xb0   :  { %634 = vmatpush1.bf16.msra.mxu1 %v2628_v1  ;;  %v2688_v1 = vld [vmem:[#allocation7 + $0x34] ss:$8 sps:$4 sm:$0xff]  }
  0xb1   :  { %1101 = vmatprep.subr.bf16.mxu1 %v2679_v60  ;;  %v2749_v60 = vld [vmem:[#allocation9 + $0x80] ss:$8 sps:$4 sm:$0xff]  }
  0xb2   :  { %855 = vmatpush1.bf16.msra.mxu0 %v2632_v5  ;;  %v2694_v5 = vld [vmem:[#allocation7 + $0x54] ss:$8 sps:$4 sm:$0xff]  }
  0xb3   :  { %856 = vmatprep.subr.bf16.mxu0 %v2637_v6  ;;  %v2692_v6 = vld [vmem:[#allocation7 + $0x50] ss:$8 sps:$4 sm:$0xff]  }
  0xb6   :  { %857 = vmatpush1.bf16.msra.mxu0 %v2635_v7  ;;  %v2697_v7 = vld [vmem:[#allocation7 + $0x64] ss:$8 sps:$4 sm:$0xff]  }
  0xb7   :  { %858 = vmatprep.subr.bf16.mxu0 %v2640_v8  ;;  %v2695_v8 = vld [vmem:[#allocation7 + $0x60] ss:$8 sps:$4 sm:$0xff]  }
  0xba   :  { %859 = vmatpush1.bf16.msra.mxu0 %v2638_v9  ;;  %v2700_v9 = vld [vmem:[#allocation7 + $0x74] ss:$8 sps:$4 sm:$0xff]  }
  0xbb   :  { %860 = vmatprep.subr.bf16.mxu0 %v2643_v10  ;;  %v2698_v10 = vld [vmem:[#allocation7 + $0x70] ss:$8 sps:$4 sm:$0xff]  }
  0xbe   :  { %861 = vmatpush1.bf16.msra.mxu0 %v2641_v11  ;;  %v2703_v11 = vld [vmem:[#allocation7 + $0x84] ss:$8 sps:$4 sm:$0xff]  }
  0xbf   :  { %862 = vmatprep.subr.bf16.mxu0 %v2646_v12  ;;  %v2701_v12 = vld [vmem:[#allocation7 + $0x80] ss:$8 sps:$4 sm:$0xff]  }
  0xc2   :  { %863 = vmatpush1.bf16.msra.mxu0 %v2644_v13  ;;  %v2706_v13 = vld [vmem:[#allocation7 + $0x94] ss:$8 sps:$4 sm:$0xff]  }
  0xc3   :  { %864 = vmatprep.subr.bf16.mxu0 %v2649_v14  ;;  %v2704_v14 = vld [vmem:[#allocation7 + $0x90] ss:$8 sps:$4 sm:$0xff]  }
  0xc6   :  { %865 = vmatpush1.bf16.msra.mxu0 %v2647_v15  ;;  %v2709_v15 = vld [vmem:[#allocation7 + $0xa4] ss:$8 sps:$4 sm:$0xff]  }
  0xc7   :  { %866 = vmatprep.subr.bf16.mxu0 %v2652_v16  ;;  %v2707_v16 = vld [vmem:[#allocation7 + $0xa0] ss:$8 sps:$4 sm:$0xff]  }
  0xca   :  { %867 = vmatpush1.bf16.msra.mxu0 %v2650_v17  ;;  %v2712_v17 = vld [vmem:[#allocation7 + $0xb4] ss:$8 sps:$4 sm:$0xff]  }
  0xcb   :  { %868 = vmatprep.subr.bf16.mxu0 %v2655_v18  ;;  %v2710_v18 = vld [vmem:[#allocation7 + $0xb0] ss:$8 sps:$4 sm:$0xff]  }
  0xce   :  { %869 = vmatpush1.bf16.msra.mxu0 %v2653_v19  ;;  %v2715_v19 = vld [vmem:[#allocation7 + $0xc4] ss:$8 sps:$4 sm:$0xff]  }
  0xcf   :  { %870 = vmatprep.subr.bf16.mxu0 %v2658_v20  ;;  %v2713_v20 = vld [vmem:[#allocation7 + $0xc0] ss:$8 sps:$4 sm:$0xff]  }
  0xd2   :  { %871 = vmatpush1.bf16.msra.mxu0 %v2656_v21  ;;  %v2718_v21 = vld [vmem:[#allocation7 + $0xd4] ss:$8 sps:$4 sm:$0xff]  }
  0xd3   :  { %872 = vmatprep.subr.bf16.mxu0 %v2661_v22  ;;  %v2716_v22 = vld [vmem:[#allocation7 + $0xd0] ss:$8 sps:$4 sm:$0xff]  }
  0xd6   :  { %873 = vmatpush1.bf16.msra.mxu0 %v2659_v23  ;;  %v431_v23 = vld [vmem:[%s3406_s4] sm:$0x3] }
  0xd7   :  { %874 = vmatprep.subr.bf16.mxu0 %v2664_v24  ;;  %v436_v24 = vrot.slane %v431_v23, %v3262_v32 }
  0xda   :  { %875 = vmatpush1.bf16.msra.mxu0 %v2662_v25 }
  0xdb   :  { %876 = vmatprep.subr.bf16.mxu0 %v2667_v26  ;;  %v440_v26 = vrot.slane %v431_v23, %v3268_v34  ;;  %v2770_v23 = vld [vmem:[#allocation9 + $0xf0] ss:$8 sps:$4 sm:$0xff]  }
  0xde   :  { %877 = vmatpush1.bf16.msra.mxu0 %v2665_v27 }
  0xdf   :  { %878 = vmatprep.subr.bf16.mxu0 %v2670_v28 }
  0xe2   :  { %879 = vmatpush1.bf16.msra.mxu0 %v2668_v29 }
  0xe3   :  { %880 = vmatprep.subr.bf16.mxu0 %v2673_v55  ;;  %v2745_v55 = vld [vmem:[#allocation9 + $0x64] ss:$8 sps:$4 sm:$0xff]  }
  0xe6   :  { %881 = vmatpush1.bf16.msra.mxu0 %v2671_v56  ;;  %v2743_v56 = vld [vmem:[#allocation9 + $0x60] ss:$8 sps:$4 sm:$0xff]  }
  0xe7   :  { %882 = vmatprep.subr.bf16.mxu0 %v2676_v57  ;;  %v2748_v57 = vld [vmem:[#allocation9 + $0x74] ss:$8 sps:$4 sm:$0xff]  }
  0xea   :  { %883 = vmatpush1.bf16.msra.mxu0 %v2674_v58  ;;  %v2746_v58 = vld [vmem:[#allocation9 + $0x70] ss:$8 sps:$4 sm:$0xff]  }
 0x180   :  { %v376_v37 = vpop.f32.mrb[0].mxu0 }
 0x181   :  { %v377_v38 = vadd.f32 %v376_v37, %v165_v35  ;;  %v378_v39 = vpop.f32.mrb[1].mxu0 }
 0x182   :  { %v379_v40 = vadd.f32 %v378_v39, %v169_v36  ;;  %v380_v41 = vpop.f32.mrb[2].mxu0  ;;  %v2721_v39 = vld [vmem:[#allocation7 + $0xe4] ss:$8 sps:$4 sm:$0xff]  }
 0x183   :  { %v389_v42 = vmul.f32 0.01, %v377_v38  ;;  %v381_v43 = vadd.f32 %v380_v41, %v165_v35  ;;  %v382_v44 = vpop.f32.mrb[3].mxu0  ;;  %vm385_vm0 = vcmp.gt.f32.partialorder %v377_v38, 0.0  ;;  %v2724_v41 = vld [vmem:[#allocation7 + $0xf4] ss:$8 sps:$4 sm:$0xff]  }
 0x184   :  { %v390_v45 = vmul.f32 0.01, %v379_v40  ;;  %v383_v46 = vadd.f32 %v382_v44, %v169_v36  ;;  %vm386_vm2 = vcmp.gt.f32.partialorder %v379_v40, 0.0  ;;  %v2727_v44 = vld [vmem:[#allocation9 + $0x4] ss:$8 sps:$4 sm:$0xff]  }
 0x185   :  { %vm387_vm1 = vcmp.gt.f32.partialorder %v381_v43, 0.0  ;;  %v391_v47 = vmul.f32 0.01, %v381_v43  ;;  %v393_v49 = vsel %vm385_vm0, %v377_v38, %v389_v42  ;;  %v2722_v42 = vld [vmem:[#allocation7 + $0xf0] ss:$8 sps:$4 sm:$0xff]   ;;  %1362 = vmatprep.subr.bf16.mxu0 %v2727_v44 }
 0x186   :  { %v392_v48 = vmul.f32 0.01, %v383_v46  ;;  %vm388_vm3 = vcmp.gt.f32.partialorder %v383_v46, 0.0  ;;  %v394_v51 = vsel %vm386_vm2, %v379_v40, %v390_v45  ;;  %v2719_v40 = vld [vmem:[#allocation7 + $0xe0] ss:$8 sps:$4 sm:$0xff]  }
 0x187   :  { %v395_v50 = vsel %vm387_vm1, %v381_v43, %v391_v47  ;;  %v2725_v43 = vld [vmem:[#allocation9] ss:$8 sps:$4 sm:$0xff]   ;;  %v2730_v45 = vld [vmem:[#allocation9 + $0x14] ss:$8 sps:$4 sm:$0xff]   ;;  %v2733_v47 = vld [vmem:[#allocation9 + $0x24] ss:$8 sps:$4 sm:$0xff]  }
 0x188   :  { %v396_v52 = vsel %vm388_vm3, %v383_v46, %v392_v48  ;;  %v397_v53 = vpack.c.bf16 %v395_v50, %v393_v49  ;;  %v2728_v46 = vld [vmem:[#allocation9 + $0x10] ss:$8 sps:$4 sm:$0xff]   ;;  %v2731_v48 = vld [vmem:[#allocation9 + $0x20] ss:$8 sps:$4 sm:$0xff]   ;;  %v2736_v49 = vld [vmem:[#allocation9 + $0x34] ss:$8 sps:$4 sm:$0xff]  }
 0x189   :  { %v398_v54 = vpack.c.bf16 %v396_v52, %v394_v51  ;;  %v2734_v50 = vld [vmem:[#allocation9 + $0x30] ss:$8 sps:$4 sm:$0xff]   ;;  %v2739_v51 = vld [vmem:[#allocation9 + $0x44] ss:$8 sps:$4 sm:$0xff]   ;;  %v2737_v52 = vld [vmem:[#allocation9 + $0x40] ss:$8 sps:$4 sm:$0xff]  }
 0x18a   :  { %v2823_v44 = vld [vmem:[#allocation10 + $0x184] ss:$24 sps:$4 sm:$0xff]  }
 0x18b   :  { %635 = vmatprep.mubr.bf16.mxu1 %v398_v54  ;;  %v2740_v54 = vld [vmem:[#allocation9 + $0x50] ss:$8 sps:$4 sm:$0xff]  }
 0x18c   :  { %636 = vmatmul.mubr.bf16.vlgmr.msra.gmra.mrb[0].mxu1 %v397_v53  ;;  %v2742_v53 = vld [vmem:[#allocation9 + $0x54] ss:$8 sps:$4 sm:$0xff]  }
 0x18d   :  { %1102 = vmatpush1.bf16.msra.mxu1 %v2677_v59  ;;  %v2751_v59 = vld [vmem:[#allocation9 + $0x84] ss:$8 sps:$4 sm:$0xff]  }
 0x18e   :  { %1103 = vmatprep.subr.bf16.mxu1 %v2682_v61  ;;  %v2754_v61 = vld [vmem:[#allocation9 + $0x94] ss:$8 sps:$4 sm:$0xff]  }
 0x191   :  { %1104 = vmatpush1.bf16.msra.mxu1 %v2680_v62  ;;  %v2752_v62 = vld [vmem:[#allocation9 + $0x90] ss:$8 sps:$4 sm:$0xff]  }
 0x192   :  { %1105 = vmatprep.subr.bf16.mxu1 %v2685_v63  ;;  %v2757_v63 = vld [vmem:[#allocation9 + $0xa4] ss:$8 sps:$4 sm:$0xff]  }
 0x195   :  { %1106 = vmatpush1.bf16.msra.mxu1 %v2683_v0  ;;  %v2755_v0 = vld [vmem:[#allocation9 + $0xa0] ss:$8 sps:$4 sm:$0xff]  }
 0x196   :  { %1107 = vmatprep.subr.bf16.mxu1 %v2688_v1  ;;  %v2760_v1 = vld [vmem:[#allocation9 + $0xb4] ss:$8 sps:$4 sm:$0xff]  }
 0x199   :  { %1108 = vmatpush1.bf16.msra.mxu1 %v2686_v2  ;;  %v2758_v2 = vld [vmem:[#allocation9 + $0xb0] ss:$8 sps:$4 sm:$0xff]  }
 0x19a   :  { %1109 = vmatprep.subr.bf16.mxu1 %v2691_v3  ;;  %v2763_v3 = vld [vmem:[#allocation9 + $0xc4] ss:$8 sps:$4 sm:$0xff]  }
 0x19d   :  { %1110 = vmatpush1.bf16.msra.mxu1 %v2689_v4  ;;  %v2761_v4 = vld [vmem:[#allocation9 + $0xc0] ss:$8 sps:$4 sm:$0xff]  }
 0x19e   :  { %1111 = vmatprep.subr.bf16.mxu1 %v2694_v5  ;;  %v680_v5 = vld [vmem:[%s3408_s6] sm:$0x3] }
 0x1a1   :  { %1112 = vmatpush1.bf16.msra.mxu1 %v2692_v6  ;;  %v685_v6 = vrot.slane %v680_v5, %v3262_v32 }
 0x1a2   :  { %1113 = vmatprep.subr.bf16.mxu1 %v2697_v7 }
 0x1a5   :  { %1114 = vmatpush1.bf16.msra.mxu1 %v2695_v8  ;;  %v689_v8 = vrot.slane %v680_v5, %v3268_v34 }
 0x1a6   :  { %1115 = vmatprep.subr.bf16.mxu1 %v2700_v9 }
 0x1a9   :  { %1116 = vmatpush1.bf16.msra.mxu1 %v2698_v10 }
 0x1aa   :  { %1117 = vmatprep.subr.bf16.mxu1 %v2703_v11 }
 0x1ad   :  { %1118 = vmatpush1.bf16.msra.mxu1 %v2701_v12 }
 0x1ae   :  { %1119 = vmatprep.subr.bf16.mxu1 %v2706_v13 }
 0x1b1   :  { %1120 = vmatpush1.bf16.msra.mxu1 %v2704_v14 }
 0x1b2   :  { %1121 = vmatprep.subr.bf16.mxu1 %v2709_v15 }
 0x1b5   :  { %1122 = vmatpush1.bf16.msra.mxu1 %v2707_v16 }
 0x1b6   :  { %1123 = vmatprep.subr.bf16.mxu1 %v2712_v17 }
 0x1b9   :  { %1124 = vmatpush1.bf16.msra.mxu1 %v2710_v18  ;;  %v2766_v18 = vld [vmem:[#allocation9 + $0xd4] ss:$8 sps:$4 sm:$0xff]  }
 0x1ba   :  { %1125 = vmatprep.subr.bf16.mxu1 %v2715_v19  ;;  %v2764_v19 = vld [vmem:[#allocation9 + $0xd0] ss:$8 sps:$4 sm:$0xff]  }
 0x1bd   :  { %1126 = vmatpush1.bf16.msra.mxu1 %v2713_v20  ;;  %v2769_v20 = vld [vmem:[#allocation9 + $0xe4] ss:$8 sps:$4 sm:$0xff]  }
 0x1be   :  { %1127 = vmatprep.subr.bf16.mxu1 %v2718_v21  ;;  %v2767_v21 = vld [vmem:[#allocation9 + $0xe0] ss:$8 sps:$4 sm:$0xff]  }
 0x1c1   :  { %1128 = vmatpush1.bf16.msra.mxu1 %v2716_v22  ;;  %v2772_v22 = vld [vmem:[#allocation9 + $0xf4] ss:$8 sps:$4 sm:$0xff]  }
 0x1c2   :  { %1129 = vmatprep.subr.bf16.mxu1 %v2721_v39  ;;  %v2803_v39 = vld [vmem:[#allocation10 + $0xf0] ss:$24 sps:$4 sm:$0xff]  }
 0x1c5   :  { %1130 = vmatpush1.bf16.msra.mxu1 %v2719_v40  ;;  %v2811_v40 = vld [vmem:[#allocation10 + $0x124] ss:$24 sps:$4 sm:$0xff]  }
 0x1c6   :  { %1131 = vmatprep.subr.bf16.mxu1 %v2724_v41  ;;  %v2809_v41 = vld [vmem:[#allocation10 + $0x120] ss:$24 sps:$4 sm:$0xff]  }
 0x1c9   :  { %1132 = vmatpush1.bf16.msra.mxu1 %v2722_v42  ;;  %v2817_v42 = vld [vmem:[#allocation10 + $0x154] ss:$24 sps:$4 sm:$0xff]  }
 0x25f   :  { %v637_v25 = vpop.f32.mrb[0].mxu1 }
 0x260   :  { %v639_v27 = vpop.f32.mrb[1].mxu1  ;;  %v638_v29 = vadd.f32 %v637_v25, %v436_v24  ;;  %v2775_v25 = vld [vmem:[#allocation10 + $0x4] ss:$24 sps:$4 sm:$0xff]  }
 0x261   :  { %v641_v28 = vpop.f32.mrb[2].mxu1  ;;  %v640_v35 = vadd.f32 %v639_v27, %v440_v26  ;;  %v2781_v27 = vld [vmem:[#allocation10 + $0x34] ss:$24 sps:$4 sm:$0xff]   ;;  %2027 = vmatprep.subr.bf16.mxu1 %v2775_v25  ;;  %v2812_v25 = vld [vmem:[#allocation10 + $0x128] ss:$24 sps:$4 sm:$0xff]  }
 0x262   :  { %v642_v30 = vadd.f32 %v641_v28, %v436_v24  ;;  %v643_v33 = vpop.f32.mrb[3].mxu1  ;;  %v2773_v24 = vld [vmem:[#allocation10] ss:$24 sps:$4 sm:$0xff]   ;;  %v2779_v28 = vld [vmem:[#allocation10 + $0x30] ss:$24 sps:$4 sm:$0xff]  }
 0x263   :  { %v644_v36 = vadd.f32 %v643_v33, %v440_v26  ;;  %v2778_v26 = vld [vmem:[#allocation10 + $0xc] ss:$24 sps:$4 sm:$0xff]  }
 0x264   :  { %v646_v37 = vpack.c.bf16 %v642_v30, %v638_v29  ;;  %v2787_v29 = vld [vmem:[#allocation10 + $0x64] ss:$24 sps:$4 sm:$0xff]   ;;  %v2785_v30 = vld [vmem:[#allocation10 + $0x60] ss:$24 sps:$4 sm:$0xff]   ;;  %v2793_v33 = vld [vmem:[#allocation10 + $0x94] ss:$24 sps:$4 sm:$0xff]  }
 0x265   :  { %v647_v38 = vpack.c.bf16 %v644_v36, %v640_v35  ;;  %v2791_v35 = vld [vmem:[#allocation10 + $0x90] ss:$24 sps:$4 sm:$0xff]   ;;  %v2799_v36 = vld [vmem:[#allocation10 + $0xc4] ss:$24 sps:$4 sm:$0xff]  }
 0x267   :  { %884 = vmatprep.mubr.bf16.mxu0 %v647_v38  ;;  %v2805_v38 = vld [vmem:[#allocation10 + $0xf4] ss:$24 sps:$4 sm:$0xff]  }
 0x268   :  { %885 = vmatmul.mubr.bf16.vlgmr.msra.gmra.mrb[4].mxu0 %v646_v37  ;;  %v2797_v37 = vld [vmem:[#allocation10 + $0xc0] ss:$24 sps:$4 sm:$0xff]  }
 0x269   :  { %1363 = vmatpush1.bf16.msra.mxu0 %v2725_v43  ;;  %v2815_v43 = vld [vmem:[#allocation10 + $0x150] ss:$24 sps:$4 sm:$0xff]  }
 0x26a   :  { %1364 = vmatprep.subr.bf16.mxu0 %v2730_v45  ;;  %v2821_v45 = vld [vmem:[#allocation10 + $0x180] ss:$24 sps:$4 sm:$0xff]  }
 0x26d   :  { %1365 = vmatpush1.bf16.msra.mxu0 %v2728_v46  ;;  %v2829_v46 = vld [vmem:[#allocation10 + $0x1b4] ss:$24 sps:$4 sm:$0xff]  }
 0x26e   :  { %1366 = vmatprep.subr.bf16.mxu0 %v2733_v47  ;;  %v2827_v47 = vld [vmem:[#allocation10 + $0x1b0] ss:$24 sps:$4 sm:$0xff]  }
 0x271   :  { %1367 = vmatpush1.bf16.msra.mxu0 %v2731_v48  ;;  %v2835_v48 = vld [vmem:[#allocation10 + $0x1e4] ss:$24 sps:$4 sm:$0xff]  }
 0x272   :  { %1368 = vmatprep.subr.bf16.mxu0 %v2736_v49  ;;  %v2833_v49 = vld [vmem:[#allocation10 + $0x1e0] ss:$24 sps:$4 sm:$0xff]  }
 0x275   :  { %1369 = vmatpush1.bf16.msra.mxu0 %v2734_v50  ;;  %v2841_v50 = vld [vmem:[#allocation10 + $0x214] ss:$24 sps:$4 sm:$0xff]  }
 0x276   :  { %1370 = vmatprep.subr.bf16.mxu0 %v2739_v51  ;;  %v2839_v51 = vld [vmem:[#allocation10 + $0x210] ss:$24 sps:$4 sm:$0xff]  }
 0x279   :  { %1371 = vmatpush1.bf16.msra.mxu0 %v2737_v52  ;;  %v2847_v52 = vld [vmem:[#allocation10 + $0x244] ss:$24 sps:$4 sm:$0xff]  }
 0x27a   :  { %1372 = vmatprep.subr.bf16.mxu0 %v2742_v53  ;;  %v2845_v53 = vld [vmem:[#allocation10 + $0x240] ss:$24 sps:$4 sm:$0xff]  }
 0x27d   :  { %1373 = vmatpush1.bf16.msra.mxu0 %v2740_v54  ;;  %v2853_v54 = vld [vmem:[#allocation10 + $0x274] ss:$24 sps:$4 sm:$0xff]  }
 0x27e   :  { %1374 = vmatprep.subr.bf16.mxu0 %v2745_v55  ;;  %v2851_v55 = vld [vmem:[#allocation10 + $0x270] ss:$24 sps:$4 sm:$0xff]  }
 0x281   :  { %1375 = vmatpush1.bf16.msra.mxu0 %v2743_v56  ;;  %v929_v56 = vld [vmem:[%s3410_s8] sm:$0x3] }
 0x282   :  { %1376 = vmatprep.subr.bf16.mxu0 %v2748_v57  ;;  %v934_v57 = vrot.slane %v929_v56, %v3262_v32 }
 0x285   :  { %1377 = vmatpush1.bf16.msra.mxu0 %v2746_v58  ;;  %v938_v58 = vrot.slane %v929_v56, %v3268_v34 }
 0x286   :  { %1378 = vmatprep.subr.bf16.mxu0 %v2751_v59 }
 0x289   :  { %1379 = vmatpush1.bf16.msra.mxu0 %v2749_v60 }
 0x28a   :  { %1380 = vmatprep.subr.bf16.mxu0 %v2754_v61 }
 0x28d   :  { %1381 = vmatpush1.bf16.msra.mxu0 %v2752_v62 }
 0x28e   :  { %1382 = vmatprep.subr.bf16.mxu0 %v2757_v63 }
 0x291   :  { %1383 = vmatpush1.bf16.msra.mxu0 %v2755_v0 }
 0x292   :  { %1384 = vmatprep.subr.bf16.mxu0 %v2760_v1 }
 0x295   :  { %1385 = vmatpush1.bf16.msra.mxu0 %v2758_v2 }
 0x296   :  { %1386 = vmatprep.subr.bf16.mxu0 %v2763_v3 }
 0x299   :  { %1387 = vmatpush1.bf16.msra.mxu0 %v2761_v4 }
 0x29a   :  { %1388 = vmatprep.subr.bf16.mxu0 %v2766_v18  ;;  %v2796_v18 = vld [vmem:[#allocation10 + $0x9c] ss:$24 sps:$4 sm:$0xff]  }
 0x29d   :  { %1389 = vmatpush1.bf16.msra.mxu0 %v2764_v19  ;;  %v2794_v19 = vld [vmem:[#allocation10 + $0x98] ss:$24 sps:$4 sm:$0xff]  }
 0x29e   :  { %1390 = vmatprep.subr.bf16.mxu0 %v2769_v20  ;;  %v2802_v20 = vld [vmem:[#allocation10 + $0xcc] ss:$24 sps:$4 sm:$0xff]  }
 0x2a1   :  { %1391 = vmatpush1.bf16.msra.mxu0 %v2767_v21  ;;  %v2800_v21 = vld [vmem:[#allocation10 + $0xc8] ss:$24 sps:$4 sm:$0xff]  }
 0x2a2   :  { %1392 = vmatprep.subr.bf16.mxu0 %v2772_v22  ;;  %v2808_v22 = vld [vmem:[#allocation10 + $0xfc] ss:$24 sps:$4 sm:$0xff]  }
 0x2a5   :  { %1393 = vmatpush1.bf16.msra.mxu0 %v2770_v23  ;;  %v2806_v23 = vld [vmem:[#allocation10 + $0xf8] ss:$24 sps:$4 sm:$0xff]  }
 0x2a6   :  { %2070 = vmatprep.subr.bf16.mxu0 %v2778_v26  ;;  %v2820_v26 = vld [vmem:[#allocation10 + $0x15c] ss:$24 sps:$4 sm:$0xff]  }
 0x33b   :  { %v886_v7 = vpop.f32.mrb[4].mxu0 }
 0x33c   :  { %v888_v9 = vpop.f32.mrb[5].mxu0  ;;  %v887_v11 = vadd.f32 %v886_v7, %v685_v6 }
 0x33d   :  { %v890_v10 = vpop.f32.mrb[6].mxu0  ;;  %v889_v14 = vadd.f32 %v888_v9, %v689_v8 }
 0x33e   :  { %v891_v12 = vadd.f32 %v890_v10, %v685_v6  ;;  %v892_v13 = vpop.f32.mrb[7].mxu0 }
 0x33f   :  { %v893_v15 = vadd.f32 %v892_v13, %v689_v8  ;;  %v2776_v13 = vld [vmem:[#allocation10 + $0x8] ss:$24 sps:$4 sm:$0xff]  }
 0x340   :  { %v895_v16 = vpack.c.bf16 %v891_v12, %v887_v11 }
 0x341   :  { %v896_v17 = vpack.c.bf16 %v893_v15, %v889_v14  ;;  %v2784_v14 = vld [vmem:[#allocation10 + $0x3c] ss:$24 sps:$4 sm:$0xff]   ;;  %v2782_v15 = vld [vmem:[#allocation10 + $0x38] ss:$24 sps:$4 sm:$0xff]  }
 0x343   :  { %1133 = vmatprep.mubr.bf16.mxu1 %v896_v17  ;;  %v2788_v17 = vld [vmem:[#allocation10 + $0x68] ss:$24 sps:$4 sm:$0xff]  }
 0x344   :  { %1134 = vmatmul.mubr.bf16.vlgmr.msra.gmra.mrb[4].mxu1 %v895_v16  ;;  %v2790_v16 = vld [vmem:[#allocation10 + $0x6c] ss:$24 sps:$4 sm:$0xff]  }
 0x345   :  { %2028 = vmatpush1.bf16.msra.mxu1 %v2773_v24  ;;  %v2814_v24 = vld [vmem:[#allocation10 + $0x12c] ss:$24 sps:$4 sm:$0xff]  }
 0x346   :  { %2029 = vmatprep.subr.bf16.mxu1 %v2781_v27  ;;  %v2818_v27 = vld [vmem:[#allocation10 + $0x158] ss:$24 sps:$4 sm:$0xff]  }
 0x349   :  { %2030 = vmatpush1.bf16.msra.mxu1 %v2779_v28  ;;  %v2826_v28 = vld [vmem:[#allocation10 + $0x18c] ss:$24 sps:$4 sm:$0xff]  }
 0x34a   :  { %2031 = vmatprep.subr.bf16.mxu1 %v2787_v29  ;;  %v2824_v29 = vld [vmem:[#allocation10 + $0x188] ss:$24 sps:$4 sm:$0xff]  }
 0x34d   :  { %2032 = vmatpush1.bf16.msra.mxu1 %v2785_v30  ;;  %v2832_v30 = vld [vmem:[#allocation10 + $0x1bc] ss:$24 sps:$4 sm:$0xff]  }
 0x34e   :  { %2033 = vmatprep.subr.bf16.mxu1 %v2793_v33  ;;  %v2830_v33 = vld [vmem:[#allocation10 + $0x1b8] ss:$24 sps:$4 sm:$0xff]  }
 0x351   :  { %2034 = vmatpush1.bf16.msra.mxu1 %v2791_v35  ;;  %v2838_v35 = vld [vmem:[#allocation10 + $0x1ec] ss:$24 sps:$4 sm:$0xff]  }
 0x352   :  { %2035 = vmatprep.subr.bf16.mxu1 %v2799_v36  ;;  %v2836_v36 = vld [vmem:[#allocation10 + $0x1e8] ss:$24 sps:$4 sm:$0xff]  }
 0x355   :  { %2036 = vmatpush1.bf16.msra.mxu1 %v2797_v37  ;;  %v2844_v37 = vld [vmem:[#allocation10 + $0x21c] ss:$24 sps:$4 sm:$0xff]  }
 0x356   :  { %2037 = vmatprep.subr.bf16.mxu1 %v2805_v38  ;;  %v2842_v38 = vld [vmem:[#allocation10 + $0x218] ss:$24 sps:$4 sm:$0xff]  }
 0x359   :  { %2038 = vmatpush1.bf16.msra.mxu1 %v2803_v39  ;;  %v2850_v39 = vld [vmem:[#allocation10 + $0x24c] ss:$24 sps:$4 sm:$0xff]  }
 0x35a   :  { %2039 = vmatprep.subr.bf16.mxu1 %v2811_v40  ;;  %v2848_v40 = vld [vmem:[#allocation10 + $0x248] ss:$24 sps:$4 sm:$0xff]  }
 0x35d   :  { %2040 = vmatpush1.bf16.msra.mxu1 %v2809_v41  ;;  %v2856_v41 = vld [vmem:[#allocation10 + $0x27c] ss:$24 sps:$4 sm:$0xff]  }
 0x35e   :  { %2041 = vmatprep.subr.bf16.mxu1 %v2817_v42  ;;  %v2854_v42 = vld [vmem:[#allocation10 + $0x278] ss:$24 sps:$4 sm:$0xff]  }
 0x361   :  { %2042 = vmatpush1.bf16.msra.mxu1 %v2815_v43  ;;  %v2859_v43 = vld [vmem:[#allocation10 + $0x2a4] ss:$24 sps:$4 sm:$0xff]  }
 0x362   :  { %2043 = vmatprep.subr.bf16.mxu1 %v2823_v44  ;;  %v2857_v44 = vld [vmem:[#allocation10 + $0x2a0] ss:$24 sps:$4 sm:$0xff]  }
 0x365   :  { %2044 = vmatpush1.bf16.msra.mxu1 %v2821_v45  ;;  %v2862_v45 = vld [vmem:[#allocation10 + $0x2ac] ss:$24 sps:$4 sm:$0xff]  }
 0x366   :  { %2045 = vmatprep.subr.bf16.mxu1 %v2829_v46  ;;  %v2860_v46 = vld [vmem:[#allocation10 + $0x2a8] ss:$24 sps:$4 sm:$0xff]  }
 0x369   :  { %2046 = vmatpush1.bf16.msra.mxu1 %v2827_v47  ;;  %v2865_v47 = vld [vmem:[#allocation10 + $0x2d4] ss:$24 sps:$4 sm:$0xff]  }
 0x36a   :  { %2047 = vmatprep.subr.bf16.mxu1 %v2835_v48  ;;  %v2863_v48 = vld [vmem:[#allocation10 + $0x2d0] ss:$24 sps:$4 sm:$0xff]  }
 0x36d   :  { %2048 = vmatpush1.bf16.msra.mxu1 %v2833_v49  ;;  %v2868_v49 = vld [vmem:[#allocation10 + $0x2dc] ss:$24 sps:$4 sm:$0xff]  }
 0x36e   :  { %2049 = vmatprep.subr.bf16.mxu1 %v2841_v50  ;;  %v2866_v50 = vld [vmem:[#allocation10 + $0x2d8] ss:$24 sps:$4 sm:$0xff]  }
 0x371   :  { %2050 = vmatpush1.bf16.msra.mxu1 %v2839_v51  ;;  %v2871_v51 = vld [vmem:[#allocation10 + $0x14] ss:$24 sps:$4 sm:$0xff]  }
 0x372   :  { %2051 = vmatprep.subr.bf16.mxu1 %v2847_v52  ;;  %v1190_v52 = vld [vmem:[%s3412_s10] sm:$0x3] }
 0x375   :  { %2052 = vmatpush1.bf16.msra.mxu1 %v2845_v53  ;;  %v1195_v53 = vrot.slane %v1190_v52, %v3262_v32 }
 0x376   :  { %2053 = vmatprep.subr.bf16.mxu1 %v2853_v54  ;;  %v1199_v54 = vrot.slane %v1190_v52, %v3268_v34 }
 0x379   :  { %2054 = vmatpush1.bf16.msra.mxu1 %v2851_v55 }
 0x37a   :  { %2055 = vmatprep.subr.bf16.mxu1 %v2859_v43  ;;  %v1515_v43 = vld [vmem:[%s3414_s12] sm:$0x3f] }
 0x37d   :  { %2056 = vmatpush1.bf16.msra.mxu1 %v2857_v44  ;;  %v1527_v44 = vsub.s32 2, %v3259_v31 }
 0x37e   :  { %2057 = vmatprep.subr.bf16.mxu1 %v2865_v47  ;;  %v1524_v47 = vrot.slane %v1515_v43, %v3268_v34 }
 0x381   :  { %2058 = vmatpush1.bf16.msra.mxu1 %v2863_v48 }
 0x382   :  { %2113 = vmatprep.subr.bf16.mxu1 %v2871_v51 }
 0x417   :  { %v1135_v59 = vpop.f32.mrb[4].mxu1 }
 0x418   :  { %v1136_v60 = vadd.f32 %v1135_v59, %v934_v57  ;;  %v1137_v61 = vpop.f32.mrb[5].mxu1 }
 0x419   :  { %v1138_v62 = vadd.f32 %v1137_v61, %v938_v58  ;;  %v1139_v63 = vpop.f32.mrb[6].mxu1 }
 0x41a   :  { %v1148_v0 = vmul.f32 0.01, %v1136_v60  ;;  %v1140_v1 = vadd.f32 %v1139_v63, %v934_v57  ;;  %v1141_v2 = vpop.f32.mrb[7].mxu1  ;;  %vm1144_vm4 = vcmp.gt.f32.partialorder %v1136_v60, 0.0 }
 0x41b   :  { %v1149_v3 = vmul.f32 0.01, %v1138_v62  ;;  %v1142_v4 = vadd.f32 %v1141_v2, %v938_v58  ;;  %vm1145_vm5 = vcmp.gt.f32.partialorder %v1138_v62, 0.0 }
 0x41c   :  { %vm1146_vm6 = vcmp.gt.f32.partialorder %v1140_v1, 0.0  ;;  %v1150_v5 = vmul.f32 0.01, %v1140_v1  ;;  %v1152_v7 = vsel %vm1144_vm4, %v1136_v60, %v1148_v0 }
 0x41d   :  { %vm1147_vm7 = vcmp.gt.f32.partialorder %v1142_v4, 0.0  ;;  %v1151_v6 = vmul.f32 0.01, %v1142_v4  ;;  %v1153_v10 = vsel %vm1145_vm5, %v1138_v62, %v1149_v3 }
 0x41e   :  { %v1154_v8 = vsel %vm1146_vm6, %v1140_v1, %v1150_v5 }
 0x41f   :  { %v1156_v9 = vpack.c.bf16 %v1154_v8, %v1152_v7  ;;  %v1155_v11 = vsel %vm1147_vm7, %v1142_v4, %v1151_v6 }
 0x420   :  { %v1157_v12 = vpack.c.bf16 %v1155_v11, %v1153_v10  ;;  %v2874_v10 = vld [vmem:[#allocation10 + $0x44] ss:$24 sps:$4 sm:$0xff]   ;;  %v2872_v11 = vld [vmem:[#allocation10 + $0x40] ss:$24 sps:$4 sm:$0xff]  }
 0x422   :  { %1394 = vmatprep.mubr.bf16.mxu0 %v1157_v12  ;;  %v2877_v12 = vld [vmem:[#allocation10 + $0x74] ss:$24 sps:$4 sm:$0xff]  }
 0x423   :  { %1395 = vmatmul.mubr.bf16.vlgmr.msra.gmra.mrb[8].mxu0 %v1156_v9  ;;  %v2869_v9 = vld [vmem:[#allocation10 + $0x10] ss:$24 sps:$4 sm:$0xff]  }
 0x424   :  { %2071 = vmatpush1.bf16.msra.mxu0 %v2776_v13  ;;  %v2875_v13 = vld [vmem:[#allocation10 + $0x70] ss:$24 sps:$4 sm:$0xff]  }
 0x425   :  { %2072 = vmatprep.subr.bf16.mxu0 %v2784_v14  ;;  %v2880_v14 = vld [vmem:[#allocation10 + $0xa4] ss:$24 sps:$4 sm:$0xff]  }
 0x428   :  { %2073 = vmatpush1.bf16.msra.mxu0 %v2782_v15  ;;  %v2878_v15 = vld [vmem:[#allocation10 + $0xa0] ss:$24 sps:$4 sm:$0xff]  }
 0x429   :  { %2074 = vmatprep.subr.bf16.mxu0 %v2790_v16  ;;  %v2883_v16 = vld [vmem:[#allocation10 + $0xd4] ss:$24 sps:$4 sm:$0xff]  }
 0x42c   :  { %2075 = vmatpush1.bf16.msra.mxu0 %v2788_v17  ;;  %v2881_v17 = vld [vmem:[#allocation10 + $0xd0] ss:$24 sps:$4 sm:$0xff]  }
 0x42d   :  { %2076 = vmatprep.subr.bf16.mxu0 %v2796_v18  ;;  %v2886_v18 = vld [vmem:[#allocation10 + $0x104] ss:$24 sps:$4 sm:$0xff]  }
 0x430   :  { %2077 = vmatpush1.bf16.msra.mxu0 %v2794_v19  ;;  %v2884_v19 = vld [vmem:[#allocation10 + $0x100] ss:$24 sps:$4 sm:$0xff]  }
 0x431   :  { %2078 = vmatprep.subr.bf16.mxu0 %v2802_v20  ;;  %v2889_v20 = vld [vmem:[#allocation10 + $0x134] ss:$24 sps:$4 sm:$0xff]  }
 0x434   :  { %2079 = vmatpush1.bf16.msra.mxu0 %v2800_v21  ;;  %v2887_v21 = vld [vmem:[#allocation10 + $0x130] ss:$24 sps:$4 sm:$0xff]  }
 0x435   :  { %2080 = vmatprep.subr.bf16.mxu0 %v2808_v22  ;;  %v2892_v22 = vld [vmem:[#allocation10 + $0x164] ss:$24 sps:$4 sm:$0xff]  }
 0x438   :  { %2081 = vmatpush1.bf16.msra.mxu0 %v2806_v23  ;;  %v2890_v23 = vld [vmem:[#allocation10 + $0x160] ss:$24 sps:$4 sm:$0xff]  }
 0x439   :  { %2082 = vmatprep.subr.bf16.mxu0 %v2814_v24  ;;  %v2895_v24 = vld [vmem:[#allocation10 + $0x194] ss:$24 sps:$4 sm:$0xff]  }
 0x43c   :  { %2083 = vmatpush1.bf16.msra.mxu0 %v2812_v25  ;;  %v2893_v25 = vld [vmem:[#allocation10 + $0x190] ss:$24 sps:$4 sm:$0xff]  }
 0x43d   :  { %2084 = vmatprep.subr.bf16.mxu0 %v2820_v26  ;;  %v2898_v26 = vld [vmem:[#allocation10 + $0x1c4] ss:$24 sps:$4 sm:$0xff]  }
 0x440   :  { %2085 = vmatpush1.bf16.msra.mxu0 %v2818_v27  ;;  %v2896_v27 = vld [vmem:[#allocation10 + $0x1c0] ss:$24 sps:$4 sm:$0xff]  }
 0x441   :  { %2086 = vmatprep.subr.bf16.mxu0 %v2826_v28  ;;  %v2901_v28 = vld [vmem:[#allocation10 + $0x1f4] ss:$24 sps:$4 sm:$0xff]  }
 0x444   :  { %2087 = vmatpush1.bf16.msra.mxu0 %v2824_v29  ;;  %v2899_v29 = vld [vmem:[#allocation10 + $0x1f0] ss:$24 sps:$4 sm:$0xff]  }
 0x445   :  { %2088 = vmatprep.subr.bf16.mxu0 %v2832_v30  ;;  %v2904_v30 = vld [vmem:[#allocation10 + $0x224] ss:$24 sps:$4 sm:$0xff]  }
 0x448   :  { %2089 = vmatpush1.bf16.msra.mxu0 %v2830_v33  ;;  %v2902_v33 = vld [vmem:[#allocation10 + $0x220] ss:$24 sps:$4 sm:$0xff]  }
 0x449   :  { %2090 = vmatprep.subr.bf16.mxu0 %v2838_v35  ;;  %v2907_v35 = vld [vmem:[#allocation10 + $0x254] ss:$24 sps:$4 sm:$0xff]  }
 0x44c   :  { %2091 = vmatpush1.bf16.msra.mxu0 %v2836_v36  ;;  %v2905_v36 = vld [vmem:[#allocation10 + $0x250] ss:$24 sps:$4 sm:$0xff]  }
 0x44d   :  { %2092 = vmatprep.subr.bf16.mxu0 %v2844_v37  ;;  %v2910_v37 = vld [vmem:[#allocation10 + $0x284] ss:$24 sps:$4 sm:$0xff]  }
 0x450   :  { %2093 = vmatpush1.bf16.msra.mxu0 %v2842_v38  ;;  %v2908_v38 = vld [vmem:[#allocation10 + $0x280] ss:$24 sps:$4 sm:$0xff]  }
 0x451   :  { %2094 = vmatprep.subr.bf16.mxu0 %v2850_v39  ;;  %v2913_v39 = vld [vmem:[#allocation10 + $0x2b4] ss:$24 sps:$4 sm:$0xff]  }
 0x454   :  { %2095 = vmatpush1.bf16.msra.mxu0 %v2848_v40  ;;  %v2911_v40 = vld [vmem:[#allocation10 + $0x2b0] ss:$24 sps:$4 sm:$0xff]  }
 0x455   :  { %2096 = vmatprep.subr.bf16.mxu0 %v2856_v41  ;;  %v2916_v41 = vld [vmem:[#allocation10 + $0x2e4] ss:$24 sps:$4 sm:$0xff]  }
 0x458   :  { %2097 = vmatpush1.bf16.msra.mxu0 %v2854_v42  ;;  %v2914_v42 = vld [vmem:[#allocation10 + $0x2e0] ss:$24 sps:$4 sm:$0xff]  }
 0x459   :  { %2098 = vmatprep.subr.bf16.mxu0 %v2862_v45  ;;  %v1520_v45 = vrot.slane %v1515_v43, %v3262_v32 }
 0x45c   :  { %2099 = vmatpush1.bf16.msra.mxu0 %v2860_v46  ;;  %v1528_v46 = vrot.slane %v1515_v43, %v1527_v44 }
 0x45d   :  { %2100 = vmatprep.subr.bf16.mxu0 %v2868_v49 }
 0x460   :  { %2101 = vmatpush1.bf16.msra.mxu0 %v2866_v50 }
 0x4f6   :  { %v1396_v55 = vpop.f32.mrb[8].mxu0 }
 0x4f7   :  { %v1397_v56 = vadd.f32 %v1396_v55, %v1195_v53  ;;  %v1398_v57 = vpop.f32.mrb[9].mxu0 }
 0x4f8   :  { %v1399_v58 = vadd.f32 %v1398_v57, %v1199_v54  ;;  %v1400_v59 = vpop.f32.mrb[10].mxu0 }
 0x4f9   :  { %v1409_v60 = vmul.f32 0.01, %v1397_v56  ;;  %v1401_v61 = vadd.f32 %v1400_v59, %v1195_v53  ;;  %v1402_v62 = vpop.f32.mrb[11].mxu0  ;;  %vm1405_vm8 = vcmp.gt.f32.partialorder %v1397_v56, 0.0 }
 0x4fa   :  { %v1410_v63 = vmul.f32 0.01, %v1399_v58  ;;  %v1403_v0 = vadd.f32 %v1402_v62, %v1199_v54  ;;  %vm1406_vm9 = vcmp.gt.f32.partialorder %v1399_v58, 0.0 }
 0x4fb   :  { %vm1407_vm10 = vcmp.gt.f32.partialorder %v1401_v61, 0.0  ;;  %v1411_v1 = vmul.f32 0.01, %v1401_v61  ;;  %v1413_v3 = vsel %vm1405_vm8, %v1397_v56, %v1409_v60 }
 0x4fc   :  { %vm1408_vm11 = vcmp.gt.f32.partialorder %v1403_v0, 0.0  ;;  %v1412_v2 = vmul.f32 0.01, %v1403_v0  ;;  %v1414_v6 = vsel %vm1406_vm9, %v1399_v58, %v1410_v63 }
 0x4fd   :  { %v1415_v4 = vsel %vm1407_vm10, %v1401_v61, %v1411_v1 }
 0x4fe   :  { %v3292_v5 = vpack.c.bf16 %v1415_v4, %v1413_v3  ;;  %v1416_v7 = vsel %vm1408_vm11, %v1403_v0, %v1412_v2 }
 0x4ff   :  { %v1418_v8 = vpack.c.bf16 %v1416_v7, %v1414_v6 }
 0x501   :  { %2059 = vmatprep.mubr.bf16.mxu1 %v1418_v8  ;;  %2102 = vmatprep.mubr.bf16.mxu0 %v1418_v8 }
 0x502   :  { %2060 = vmatmul.mubr.bf16.vlgmr.msra.gmra.mrb[8].mxu1 %v3292_v5  ;;  %2103 = vmatmul.mubr.bf16.vlgmr.msra.gmra.mrb[12].mxu0 %v3292_v5 }
 0x503   :  { %2114 = vmatpush1.bf16.msra.mxu1 %v2869_v9  ;;  %2145 = vmatprep.mubr.bf16.mxu1 %v1418_v8 }
 0x504   :  { %2115 = vmatprep.subr.bf16.mxu1 %v2874_v10 }
 0x507   :  { %2116 = vmatpush1.bf16.msra.mxu1 %v2872_v11 }
 0x508   :  { %2117 = vmatprep.subr.bf16.mxu1 %v2877_v12 }
 0x50b   :  { %2118 = vmatpush1.bf16.msra.mxu1 %v2875_v13 }
 0x50c   :  { %2119 = vmatprep.subr.bf16.mxu1 %v2880_v14 }
 0x50f   :  { %2120 = vmatpush1.bf16.msra.mxu1 %v2878_v15 }
 0x510   :  { %2121 = vmatprep.subr.bf16.mxu1 %v2883_v16  ;;  %v1531_v16 = vsub.s32 3, %v3259_v31 }
 0x513   :  { %2122 = vmatpush1.bf16.msra.mxu1 %v2881_v17  ;;  %v1535_v17 = vsub.s32 4, %v3259_v31 }
 0x514   :  { %2123 = vmatprep.subr.bf16.mxu1 %v2886_v18  ;;  %v1539_v18 = vsub.s32 5, %v3259_v31 }
 0x517   :  { %2124 = vmatpush1.bf16.msra.mxu1 %v2884_v19  ;;  %v1532_v19 = vrot.slane %v1515_v43, %v1531_v16 }
 0x518   :  { %2125 = vmatprep.subr.bf16.mxu1 %v2889_v20  ;;  %v1536_v20 = vrot.slane %v1515_v43, %v1535_v17 }
 0x51b   :  { %2126 = vmatpush1.bf16.msra.mxu1 %v2887_v21  ;;  %v1540_v21 = vrot.slane %v1515_v43, %v1539_v18 }
 0x51c   :  { %2127 = vmatprep.subr.bf16.mxu1 %v2892_v22 }
 0x51f   :  { %2128 = vmatpush1.bf16.msra.mxu1 %v2890_v23 }
 0x520   :  { %2129 = vmatprep.subr.bf16.mxu1 %v2895_v24 }
 0x523   :  { %2130 = vmatpush1.bf16.msra.mxu1 %v2893_v25 }
 0x524   :  { %2131 = vmatprep.subr.bf16.mxu1 %v2898_v26 }
 0x527   :  { %2132 = vmatpush1.bf16.msra.mxu1 %v2896_v27 }
 0x528   :  { %2133 = vmatprep.subr.bf16.mxu1 %v2901_v28 }
 0x52b   :  { %2134 = vmatpush1.bf16.msra.mxu1 %v2899_v29 }
 0x52c   :  { %2135 = vmatprep.subr.bf16.mxu1 %v2904_v30 }
 0x52f   :  { %2136 = vmatpush1.bf16.msra.mxu1 %v2902_v33 }
 0x530   :  { %2137 = vmatprep.subr.bf16.mxu1 %v2907_v35 }
 0x533   :  { %2138 = vmatpush1.bf16.msra.mxu1 %v2905_v36 }
 0x534   :  { %2139 = vmatprep.subr.bf16.mxu1 %v2910_v37 }
 0x537   :  { %2140 = vmatpush1.bf16.msra.mxu1 %v2908_v38 }
 0x538   :  { %2141 = vmatprep.subr.bf16.mxu1 %v2913_v39 }
 0x53b   :  { %2142 = vmatpush1.bf16.msra.mxu1 %v2911_v40 }
 0x53c   :  { %2143 = vmatprep.subr.bf16.mxu1 %v2916_v41 }
 0x53f   :  { %2144 = vmatpush1.bf16.msra.mxu1 %v2914_v42 }
 0x542   :  { %2146 = vmatmul.mubr.bf16.vlgmr.msra.gmra.mrb[12].mxu1 %v3292_v5 }
 0x5d5   :  { %v2061_v48 = vpop.f32.mrb[8].mxu1  ;;  %v2104_v49 = vpop.f32.mrb[12].mxu0 }
 0x5d6   :  { %v2062_v50 = vadd.f32 %v2061_v48, %v1520_v45  ;;  %v2063_v51 = vpop.f32.mrb[9].mxu1  ;;  %v2106_v52 = vpop.f32.mrb[13].mxu0  ;;  %v2105_v53 = vadd.f32 %v2104_v49, %v1528_v46 }
 0x5d7   :  { %v2064_v54 = vadd.f32 %v2063_v51, %v1524_v47  ;;  %v2065_v55 = vpop.f32.mrb[10].mxu1  ;;  %v2108_v56 = vpop.f32.mrb[14].mxu0  ;;  %v2107_v23 = vadd.f32 %v2106_v52, %v1532_v19 }
 0x5d8   :  { %v2156_v57 = vmul.f32 %v2062_v50, %v2062_v50  ;;  %v2066_v58 = vadd.f32 %v2065_v55, %v1520_v45  ;;  %v2067_v59 = vpop.f32.mrb[11].mxu1  ;;  %v2110_v60 = vpop.f32.mrb[15].mxu0  ;;  %v2109_v62 = vadd.f32 %v2108_v56, %v1528_v46  ;;  %v2162_v0 = vmul.f32 %v2105_v53, %v2105_v53 }
 0x5d9   :  { %v2158_v61 = vmul.f32 %v2064_v54, %v2064_v54  ;;  %v2068_v63 = vadd.f32 %v2067_v59, %v1524_v47  ;;  %v2111_v29 = vadd.f32 %v2110_v60, %v1532_v19 }
 0x5da   :  { %v2157_v32 = vmul.f32 %v2066_v58, %v2066_v58  ;;  %v2163_v3 = vmul.f32 %v2109_v62, %v2109_v62 }
 0x5db   :  { %v2160_v1 = vadd.f32 %v2158_v61, %v2156_v57  ;;  %v2159_v34 = vmul.f32 %v2068_v63, %v2068_v63 }
 0x5dd   :  { %v2164_v2 = vadd.f32 %v2162_v0, %v2160_v1  ;;  %v2161_v4 = vadd.f32 %v2159_v34, %v2157_v32 }
 0x5df   :  { %v2166_v5 = vmax.f32 %v2164_v2, 1e-24  ;;  %v2165_v6 = vadd.f32 %v2163_v3, %v2161_v4 }
 0x5e1   :  { %2917 = vrsqrt.f32 %v2166_v5  ;;  %v2167_v7 = vmax.f32 %v2165_v6, 1e-24 }
 0x5e3   :  { %2919 = vrsqrt.f32 %v2167_v7 }
 0x5eb   :  { %v2918_v8 = vpop.eup %2917 }
 0x5ec   :  { %v3303_v9 = vmul.f32 %v2918_v8, %v2064_v54  ;;  %v3305_v10 = vmul.f32 %v2918_v8, %v2062_v50  ;;  %v3307_v11 = vmul.f32 %v2918_v8, %v2105_v53 }
 0x5ed   :  { %v2920_v12 = vpop.eup %2919 }
 0x5ee   :  { %2239 = vst [vmem:[%s3415_s13 + $0x18] sm:$0xff] %v3303_v9  ;;  %2236 = vst [vmem:[%s3415_s13] sm:$0xff] %v3305_v10  ;;  %v3317_v13 = vmul.f32 %v2920_v12, %v2068_v63  ;;  %v3319_v14 = vmul.f32 %v2920_v12, %v2066_v58  ;;  %v3325_v15 = vmul.f32 %v2920_v12, %v2109_v62 }
 0x5ef   :  { %2242 = vst [vmem:[%s3415_s13 + $0x30] sm:$0xff] %v3307_v11  ;;  %v2176_v28 = vmul.f32 %v3305_v10, %v2107_v23 }
 0x5f0   :  { %2248 = vst [vmem:[%s3415_s13 + $0x60] sm:$0xff] %v3317_v13  ;;  %2245 = vst [vmem:[%s3415_s13 + $0x48] sm:$0xff] %v3319_v14  ;;  %v2177_v31 = vmul.f32 %v3319_v14, %v2111_v29 }
 0x5f1   :  { %2251 = vst [vmem:[%s3415_s13 + $0x78] sm:$0xff] %v3325_v15 }
 0x615   :  { %v2147_v22 = vpop.f32.mrb[12].mxu1 }
 0x616   :  { %v2148_v24 = vadd.f32 %v2147_v22, %v1536_v20  ;;  %v2149_v25 = vpop.f32.mrb[13].mxu1 }
 0x617   :  { %v2150_v26 = vadd.f32 %v2149_v25, %v1540_v21  ;;  %v2151_v27 = vpop.f32.mrb[14].mxu1 }
 0x618   :  { %v2178_v30 = vmul.f32 %v3303_v9, %v2148_v24  ;;  %v2152_v33 = vadd.f32 %v2151_v27, %v1536_v20  ;;  %v2153_v35 = vpop.f32.mrb[15].mxu1 }
 0x619   :  { %v2182_v36 = vmul.f32 %v3307_v11, %v2150_v26  ;;  %v2154_v37 = vadd.f32 %v2153_v35, %v1540_v21 }
 0x61a   :  { %v2180_v38 = vadd.f32 %v2178_v30, %v2176_v28  ;;  %v2179_v39 = vmul.f32 %v3317_v13, %v2152_v33 }
 0x61b   :  { %v2183_v40 = vmul.f32 %v3325_v15, %v2154_v37 }
 0x61c   :  { %v2184_v41 = vadd.f32 %v2182_v36, %v2180_v38  ;;  %v2181_v42 = vadd.f32 %v2179_v39, %v2177_v31 }
 0x61e   :  { %v2186_v43 = vmul.f32 %v2184_v41, %v3305_v10  ;;  %v2190_v44 = vmul.f32 %v2184_v41, %v3303_v9  ;;  %v2194_v45 = vmul.f32 %v2184_v41, %v3307_v11  ;;  %v2185_v46 = vadd.f32 %v2183_v40, %v2181_v42 }
 0x620   :  { %v2188_v47 = vsub.f32 %v2107_v23, %v2186_v43  ;;  %v2192_v48 = vsub.f32 %v2148_v24, %v2190_v44  ;;  %v2196_v49 = vsub.f32 %v2150_v26, %v2194_v45  ;;  %v2187_v50 = vmul.f32 %v2185_v46, %v3319_v14 }
 0x621   :  { %v2191_v51 = vmul.f32 %v2185_v46, %v3317_v13  ;;  %v2195_v52 = vmul.f32 %v2185_v46, %v3325_v15 }
 0x622   :  { %v2198_v53 = vmul.f32 %v2188_v47, %v2188_v47  ;;  %v2200_v54 = vmul.f32 %v2192_v48, %v2192_v48  ;;  %v2189_v55 = vsub.f32 %v2111_v29, %v2187_v50  ;;  %v2204_v59 = vmul.f32 %v2196_v49, %v2196_v49 }
 0x623   :  { %v2193_v56 = vsub.f32 %v2152_v33, %v2191_v51  ;;  %v2197_v57 = vsub.f32 %v2154_v37, %v2195_v52 }
 0x624   :  { %v2202_v58 = vadd.f32 %v2200_v54, %v2198_v53  ;;  %v2199_v60 = vmul.f32 %v2189_v55, %v2189_v55 }
 0x625   :  { %v2201_v61 = vmul.f32 %v2193_v56, %v2193_v56  ;;  %v2205_v32 = vmul.f32 %v2197_v57, %v2197_v57 }
 0x626   :  { %v2206_v62 = vadd.f32 %v2204_v59, %v2202_v58 }
 0x627   :  { %v2203_v63 = vadd.f32 %v2201_v61, %v2199_v60 }
 0x628   :  { %v2208_v0 = vmax.f32 %v2206_v62, 1e-24 }
 0x629   :  { %v2207_v1 = vadd.f32 %v2205_v32, %v2203_v63 }
 0x62a   :  { %2921 = vrsqrt.f32 %v2208_v0 }
 0x62b   :  { %v2209_v34 = vmax.f32 %v2207_v1, 1e-24 }
 0x62d   :  { %2923 = vrsqrt.f32 %v2209_v34 }
 0x634   :  { %v2922_v2 = vpop.eup %2921 }
 0x635   :  { %v2212_v3 = vmul.f32 %v2922_v2, %v2188_v47  ;;  %v2214_v4 = vmul.f32 %v2922_v2, %v2192_v48  ;;  %v2216_v5 = vmul.f32 %v2922_v2, %v2196_v49 }
 0x637   :  { %v2924_v6 = vpop.eup %2923  ;;  %v2218_v7 = vmul.f32 %v2216_v5, %v3303_v9  ;;  %v2220_v8 = vmul.f32 %v2214_v4, %v3307_v11  ;;  %v2224_v12 = vmul.f32 %v2212_v3, %v3307_v11  ;;  %v2226_v16 = vmul.f32 %v2216_v5, %v3305_v10  ;;  %2237 = vst [vmem:[%s3415_s13 + $0x8] sm:$0xff] %v2212_v3 }
 0x638   :  { %2240 = vst [vmem:[%s3415_s13 + $0x20] sm:$0xff] %v2214_v4  ;;  %2243 = vst [vmem:[%s3415_s13 + $0x38] sm:$0xff] %v2216_v5  ;;  %v2230_v17 = vmul.f32 %v2214_v4, %v3305_v10  ;;  %v2232_v18 = vmul.f32 %v2212_v3, %v3303_v9  ;;  %v2213_v19 = vmul.f32 %v2924_v6, %v2189_v55 }
 0x639   :  { %v2215_v11 = vmul.f32 %v2924_v6, %v2193_v56  ;;  %v2222_v20 = vsub.f32 %v2218_v7, %v2220_v8  ;;  %v2228_v21 = vsub.f32 %v2224_v12, %v2226_v16  ;;  %v2217_v22 = vmul.f32 %v2924_v6, %v2197_v57 }
 0x63a   :  { %v2234_v23 = vsub.f32 %v2230_v17, %v2232_v18  ;;  %v2225_v25 = vmul.f32 %v2213_v19, %v3325_v15  ;;  %2246 = vst [vmem:[%s3415_s13 + $0x50] sm:$0xff] %v2213_v19 }
 0x63b   :  { %v2221_v24 = vmul.f32 %v2215_v11, %v3325_v15  ;;  %v2231_v26 = vmul.f32 %v2215_v11, %v3319_v14  ;;  %2249 = vst [vmem:[%s3415_s13 + $0x68] sm:$0xff] %v2215_v11  ;;  %2238 = vst [vmem:[%s3415_s13 + $0x10] sm:$0xff] %v2222_v20  ;;  %v2219_v9 = vmul.f32 %v2217_v22, %v3317_v13 }
 0x63c   :  { %2241 = vst [vmem:[%s3415_s13 + $0x28] sm:$0xff] %v2228_v21  ;;  %v2227_v10 = vmul.f32 %v2217_v22, %v3319_v14  ;;  %v2233_v15 = vmul.f32 %v2213_v19, %v3317_v13  ;;  %2252 = vst [vmem:[%s3415_s13 + $0x80] sm:$0xff] %v2217_v22 }
 0x63d   :  { %2244 = vst [vmem:[%s3415_s13 + $0x40] sm:$0xff] %v2234_v23  ;;  %v2223_v27 = vsub.f32 %v2219_v9, %v2221_v24 }
 0x63e   :  { %v2229_v28 = vsub.f32 %v2225_v25, %v2227_v10  ;;  %v2235_v29 = vsub.f32 %v2231_v26, %v2233_v15 }
 0x63f   :  { %2247 = vst [vmem:[%s3415_s13 + $0x58] sm:$0xff] %v2223_v27 }
 0x640   :  { %2250 = vst [vmem:[%s3415_s13 + $0x70] sm:$0xff] %v2229_v28  ;;  %2253 = vst [vmem:[%s3415_s13 + $0x88] sm:$0xff] %v2235_v29 }
 0x641   :  { %2258 = vsyncpa [#allocation3], 1 }
 0x642   :  { %2259 = vsyncpa [#allocation5], 1 }
 0x643   :  { %2260 = vsyncpa [#allocation8], 1 }
 0x644   :  { %2261 = vsyncpa [#allocation11], 1 }

</bundles_post_ra>
